<compile_context>
chip_gen: v7x
topology: tpu7x:2x2x1
jax: 0.10.0
libtpu: 0.0.40
codegen_flags: <defaults>
</compile_context>

<pallas_src>
from functools import partial

import jax
import jax.numpy as jnp
from jax import lax
from jax.experimental import pallas as pl
from jax.experimental.pallas import tpu as pltpu


# ---------------------------------------------------------------------------
# Fused Bottleneck kernel
# ---------------------------------------------------------------------------
def _bottleneck_kernel(x_ref, w1_ref, w2w_ref, w3_ref, b1_ref, b2_ref, b3_ref,
                       o_ref, y1_ref, *, row_tile):
    """conv1(1x1)+BN+ReLU -> conv2(3x3,pad=1)+BN+ReLU -> conv3(1x1)+BN+add+ReLU.

    Grid = (N, H // row_tile).
      x_ref : (1, H, W, Cin) bf16, full image, resident across row tiles.
      o_ref : (1, TH, W, Cexp) f32, one output row tile.
      y1_ref: ((H + 4) * W, width) f32 VMEM cache of conv1's output, flattened
              row-major with a 2-row zero offset so that
              y1_ref[(h + 2) * W + w, :] == relu(conv1(x))[h, w, :] and every
              row outside that range is zero (this is the 3x3 conv's H padding).
    """
    TH = row_tile
    _, H, W, Cin = x_ref.shape
    width = w1_ref.shape[1]
    Cexp = w3_ref.shape[1]
    r = pl.program_id(1)

    # --- Stage 1 (once per image): 1x1 conv + bias + ReLU into the VMEM cache.
    @pl.when(r == 0)
    def _():
        y1_ref[...] = jnp.zeros_like(y1_ref)
        x2d = x_ref[...].reshape(H * W, Cin)                       # bf16
        y1 = jnp.dot(x2d, w1_ref[...], preferred_element_type=jnp.float32)
        y1 = jnp.maximum(y1 + b1_ref[...], 0.0)
        y1_ref[2 * W:2 * W + H * W, :] = y1                        # f32

    # --- Stage 2: 3x3 conv (pad=1, stride=1) as 3 wide-K (3*width) matmuls.
    r0 = r * TH
    M = TH * W
    col = lax.broadcasted_iota(jnp.int32, (M, width), 0) % W       # image column
    acc = jnp.zeros((M, width), jnp.float32)
    for dh in range(3):
        base = pl.multiple_of((r0 + dh + 1) * W, W)
        lft = y1_ref[pl.ds(base - 1, M), :]                        # dw = 0
        ctr = y1_ref[pl.ds(base, M), :]                            # dw = 1
        rgt = y1_ref[pl.ds(base + 1, M), :]                        # dw = 2
        lft = jnp.where(col == 0, 0.0, lft)                        # left W-halo
        rgt = jnp.where(col == W - 1, 0.0, rgt)                    # right W-halo
        patch = jnp.concatenate([lft, ctr, rgt], axis=1).astype(jnp.bfloat16)
        acc = acc + jnp.dot(patch, w2w_ref[dh],
                            preferred_element_type=jnp.float32)
    y2 = jnp.maximum(acc + b2_ref[...], 0.0).astype(jnp.bfloat16)

    # --- Stage 3: 1x1 conv + bias + residual + ReLU.
    y3 = jnp.dot(y2, w3_ref[...], preferred_element_type=jnp.float32)
    identity = x_ref[:, pl.ds(r0, TH), :, :].reshape(M, Cexp).astype(jnp.float32)
    out = jnp.maximum(y3 + b3_ref[...] + identity, 0.0)
    o_ref[...] = out.reshape(1, TH, W, Cexp).astype(o_ref.dtype)


# ---------------------------------------------------------------------------
# Wrappers
# ---------------------------------------------------------------------------
def bottleneck_forward_nhwc(x_nhwc, params, stride=1, row_tile=8):
    """NHWC in / NHWC out fused Bottleneck (preferred entry point)."""
    assert stride == 1, "stride>1 needs the downsample branch (not implemented)"
    N, H, W, Cin = x_nhwc.shape
    width = params["w1"].shape[1]
    Cexp = params["w3"].shape[1]
    assert Cin == Cexp, \
        "without a downsample branch, in_channel must equal out_channel*expansion"

    TH = row_tile if (H % row_tile == 0) else H
    R = H // TH
    x = x_nhwc.astype(jnp.bfloat16)
    w2w = params["w2"].reshape(3, 3 * width, width)   # (dh, dw*width+i, o)

    kernel = partial(_bottleneck_kernel, row_tile=TH)
    return pl.pallas_call(
        kernel,
        out_shape=jax.ShapeDtypeStruct((N, H, W, Cexp), jnp.float32),
        grid=(N, R),
        in_specs=[
            pl.BlockSpec((1, H, W, Cin), lambda n, r: (n, 0, 0, 0)),      # x (resident)
            pl.BlockSpec((Cin, width), lambda n, r: (0, 0)),              # w1 (BN folded)
            pl.BlockSpec((3, 3 * width, width), lambda n, r: (0, 0, 0)),  # w2 wide-K
            pl.BlockSpec((width, Cexp), lambda n, r: (0, 0)),             # w3 (BN folded)
            pl.BlockSpec((1, width), lambda n, r: (0, 0)),                # b1
            pl.BlockSpec((1, width), lambda n, r: (0, 0)),                # b2
            pl.BlockSpec((1, Cexp), lambda n, r: (0, 0)),                 # b3
        ],
        out_specs=pl.BlockSpec((1, TH, W, Cexp), lambda n, r: (n, r, 0, 0)),
        scratch_shapes=[pltpu.VMEM(((H + 4) * W, width), jnp.float32)],
        compiler_params=pltpu.CompilerParams(
            dimension_semantics=("parallel", "arbitrary")),
    )(x, params["w1"], w2w, params["w3"],
      params["b1"], params["b2"], params["b3"])


def bottleneck_forward(x_nchw, params, stride=1, row_tile=8):
    # NCHW boundary glue to match the PyTorch convention.  In a real network
    # keep activations NHWC end-to-end and call bottleneck_forward_nhwc.
    x = jnp.transpose(x_nchw, (0, 2, 3, 1))
    y = bottleneck_forward_nhwc(x, params, stride=stride, row_tile=row_tile)
    return jnp.transpose(y, (0, 3, 1, 2))


# ---------------------------------------------------------------------------
# Parameter init (deterministic, synthetic) with BN folded into the weights
# ---------------------------------------------------------------------------
def _fold_bn(gamma, beta, mean, var, eps=1e-5):
    scale = gamma / jnp.sqrt(var + eps)
    bias = beta - mean * scale
    return scale, bias


def init_bottleneck_params(key, in_channel, out_channel,
                           groups=1, width_per_group=64):
    assert groups == 1  # TODO(synk): grouped 3x3 conv not implemented
    expansion = 4
    width = int(out_channel * (width_per_group / 64.0)) * groups
    cexp = out_channel * expansion
    keys = jax.random.split(key, 6)

    def bn(k, c):
        k1, k2, k3, k4 = jax.random.split(k, 4)
        gamma = 1.0 + 0.1 * jax.random.normal(k1, (c,), jnp.float32)
        beta = 0.1 * jax.random.normal(k2, (c,), jnp.float32)
        mean = 0.1 * jax.random.normal(k3, (c,), jnp.float32)
        var = 1.0 + 0.1 * jnp.abs(jax.random.normal(k4, (c,), jnp.float32))
        return _fold_bn(gamma, beta, mean, var)

    p = {}
    w1 = 0.1 * jax.random.normal(keys[0], (in_channel, width), jnp.float32)
    s1, b1 = bn(keys[1], width)
    p["w1"] = (w1 * s1[None, :]).astype(jnp.bfloat16)
    p["b1"] = b1[None, :].astype(jnp.float32)

    w2 = 0.1 * jax.random.normal(keys[2], (3, 3, width, width), jnp.float32)  # HWIO
    s2, b2 = bn(keys[3], width)
    p["w2"] = (w2 * s2[None, None, None, :]).astype(jnp.bfloat16)
    p["b2"] = b2[None, :].astype(jnp.float32)

    w3 = 0.1 * jax.random.normal(keys[4], (width, cexp), jnp.float32)
    s3, b3 = bn(keys[5], cexp)
    p["w3"] = (w3 * s3[None, :]).astype(jnp.bfloat16)
    p["b3"] = b3[None, :].astype(jnp.float32)
    return p


# ---------------------------------------------------------------------------
# Pure-JAX reference (same bf16-in / f32-accumulate numerics)
# ---------------------------------------------------------------------------
def bottleneck_reference(x_nchw, p, stride=1):
    x = jnp.transpose(x_nchw, (0, 2, 3, 1)).astype(jnp.bfloat16)
    dn = ("NHWC", "HWIO", "NHWC")
    y = lax.conv_general_dilated(x, p["w1"][None, None], (1, 1), "VALID",
                                 dimension_numbers=dn,
                                 preferred_element_type=jnp.float32)
    y = jnp.maximum(y + p["b1"][0], 0.0).astype(jnp.bfloat16)
    y = lax.conv_general_dilated(y, p["w2"], (stride, stride), ((1, 1), (1, 1)),
                                 dimension_numbers=dn,
                                 preferred_element_type=jnp.float32)
    y = jnp.maximum(y + p["b2"][0], 0.0).astype(jnp.bfloat16)
    y = lax.conv_general_dilated(y, p["w3"][None, None], (1, 1), "VALID",
                                 dimension_numbers=dn,
                                 preferred_element_type=jnp.float32)
    y = jnp.maximum(y + p["b3"][0] + x.astype(jnp.float32), 0.0)
    return jnp.transpose(y, (0, 3, 1, 2))


if __name__ == "__main__":
    # Small demo: batch=2, in_channel=128, out_channel=32 (-> width=32,
    # expanded out=128 channels so the output lane dim is 128-dense), 16x16.
    N, in_ch, out_ch, H, W = 2, 128, 32, 16, 16
    key = jax.random.PRNGKey(0)
    kx, kp = jax.random.split(key)
    x = jax.random.normal(kx, (N, in_ch, H, W), jnp.float32)
    params = init_bottleneck_params(kp, in_ch, out_ch)

    out = jax.block_until_ready(bottleneck_forward(x, params, stride=1, row_tile=8))
    assert out.shape == (N, out_ch * 4, H, W)

    ref = jax.block_until_ready(bottleneck_reference(x, params, stride=1))
    err = jnp.max(jnp.abs(out - ref))
    assert jnp.allclose(out, ref, rtol=2e-2, atol=2e-2), \
        f"mismatch vs. reference (max abs err {err:.4e})"

    print("KERNEL_OK")
</pallas_src>

<mosaic_0001>
module attributes {stable_mosaic.version = 11 : i64} {
  func.func @_bottleneck_kernel(%arg0: i32, %arg1: i32, %arg2: memref<1x16x16x128xbf16, #tpu.memory_space<vmem>>, %arg3: memref<128x32xbf16, #tpu.memory_space<vmem>>, %arg4: memref<3x96x32xbf16, #tpu.memory_space<vmem>>, %arg5: memref<32x128xbf16, #tpu.memory_space<vmem>>, %arg6: memref<1x32xf32, #tpu.memory_space<vmem>>, %arg7: memref<1x32xf32, #tpu.memory_space<vmem>>, %arg8: memref<1x128xf32, #tpu.memory_space<vmem>>, %arg9: memref<1x8x16x128xf32, #tpu.memory_space<vmem>>, %arg10: memref<320x32xf32, #tpu.memory_space<vmem>>) attributes {dimension_semantics = [#tpu.dimension_semantics<parallel>, #tpu.dimension_semantics<arbitrary>], iteration_bounds = array<i64: 2, 2>, scalar_prefetch = 0 : i64, scratch_operands = 1 : i64, tpu.core_type = #tpu.core_type<tc>, window_params = [{transform_indices = @transform_0, window_bounds = array<i64: 1, 16, 16, 128>}, {pipeline_mode = #tpu.pipeline_mode<synchronous>, transform_indices = @transform_1, window_bounds = array<i64: 128, 32>}, {pipeline_mode = #tpu.pipeline_mode<synchronous>, transform_indices = @transform_2, window_bounds = array<i64: 3, 96, 32>}, {pipeline_mode = #tpu.pipeline_mode<synchronous>, transform_indices = @transform_3, window_bounds = array<i64: 32, 128>}, {pipeline_mode = #tpu.pipeline_mode<synchronous>, transform_indices = @transform_4, window_bounds = array<i64: 1, 32>}, {pipeline_mode = #tpu.pipeline_mode<synchronous>, transform_indices = @transform_5, window_bounds = array<i64: 1, 32>}, {pipeline_mode = #tpu.pipeline_mode<synchronous>, transform_indices = @transform_6, window_bounds = array<i64: 1, 128>}, {transform_indices = @transform_7, window_bounds = array<i64: 1, 8, 16, 128>}]} {
    %c0_i32 = arith.constant 0 : i32
    %0 = arith.cmpi eq, %arg1, %c0_i32 : i32
    %1 = arith.extui %0 : i1 to i32
    %c0_i32_0 = arith.constant 0 : i32
    %2 = arith.cmpi ne, %1, %c0_i32_0 : i32
    scf.if %2 {
      %cst_64 = arith.constant 0.000000e+00 : f32
      %120 = vector.broadcast %cst_64 : f32 to vector<320x32xf32>
      %c0_65 = arith.constant 0 : index
      %c0_66 = arith.constant 0 : index
      %121 = vector.load %arg10[%c0_65, %c0_66] : memref<320x32xf32, #tpu.memory_space<vmem>>, vector<320x32xf32>
      tpu.vector_store %arg10[%c0_65, %c0_66], %120 {strides = array<i32>} : memref<320x32xf32, #tpu.memory_space<vmem>>, vector<320x32xf32>,
      %c0_67 = arith.constant 0 : index
      %c0_68 = arith.constant 0 : index
      %c0_69 = arith.constant 0 : index
      %c0_70 = arith.constant 0 : index
      %122 = vector.load %arg2[%c0_67, %c0_68, %c0_69, %c0_70] : memref<1x16x16x128xbf16, #tpu.memory_space<vmem>>, vector<1x16x16x128xbf16>
      %123 = vector.shape_cast %122 : vector<1x16x16x128xbf16> to vector<256x128xbf16>
      %c0_71 = arith.constant 0 : index
      %c0_72 = arith.constant 0 : index
      %124 = vector.load %arg3[%c0_71, %c0_72] : memref<128x32xbf16, #tpu.memory_space<vmem>>, vector<128x32xbf16>
      %cst_73 = arith.constant dense<0.000000e+00> : vector<256x32xf32>
      %125 = tpu.matmul %123, %124, %cst_73 {dimension_numbers = #tpu.dot_dimension_numbers<[1], [0], [0], [1], [0, 0, 1, 1], [], []>} : vector<256x128xbf16>, vector<128x32xbf16>, vector<256x32xf32> -> vector<256x32xf32>
      %c0_74 = arith.constant 0 : index
      %c0_75 = arith.constant 0 : index
      %126 = vector.load %arg6[%c0_74, %c0_75] : memref<1x32xf32, #tpu.memory_space<vmem>>, vector<1x32xf32>
      %127 = vector.broadcast %126 : vector<1x32xf32> to vector<256x32xf32>
      %128 = arith.addf %125, %127 : vector<256x32xf32>
      %cst_76 = arith.constant 0.000000e+00 : f32
      %129 = vector.broadcast %cst_76 : f32 to vector<256x32xf32>
      %130 = arith.maximumf %128, %129 : vector<256x32xf32>
      %c32 = arith.constant 32 : index
      %c0_77 = arith.constant 0 : index
      %131 = vector.load %arg10[%c32, %c0_77] : memref<320x32xf32, #tpu.memory_space<vmem>>, vector<256x32xf32>
      tpu.vector_store %arg10[%c32, %c0_77], %130 {strides = array<i32>} : memref<320x32xf32, #tpu.memory_space<vmem>>, vector<256x32xf32>,
    } else {
    }
    %c8_i32 = arith.constant 8 : i32
    %3 = arith.muli %arg1, %c8_i32 : i32
    %4 = tpu.iota {dimensions = array<i32: 0>} : vector<128x32xi32>
    %c16_i32 = arith.constant 16 : i32
    %c0_i32_1 = arith.constant 0 : i32
    %5 = arith.cmpi eq, %c16_i32, %c0_i32_1 : i32
    %c1_i32 = arith.constant 1 : i32
    %6 = arith.select %5, %c1_i32, %c16_i32 : i32
    %7 = vector.broadcast %6 : i32 to vector<128x32xi32>
    %8 = arith.remsi %4, %7 : vector<128x32xi32>
    %c0_i32_2 = arith.constant 0 : i32
    %9 = vector.broadcast %c0_i32_2 : i32 to vector<128x32xi32>
    %10 = arith.cmpi ne, %8, %9 : vector<128x32xi32>
    %c0_i32_3 = arith.constant 0 : i32
    %11 = vector.broadcast %c0_i32_3 : i32 to vector<128x32xi32>
    %12 = arith.cmpi slt, %8, %11 : vector<128x32xi32>
    %c0_i32_4 = arith.constant 0 : i32
    %13 = arith.cmpi slt, %6, %c0_i32_4 : i32
    %14 = vector.broadcast %13 : i1 to vector<128x32xi1>
    %15 = vector.broadcast %14 : vector<128x32xi1> to vector<128x32xi1>
    %16 = arith.xori %12, %15 : vector<128x32xi1>
    %17 = arith.andi %16, %10 : vector<128x32xi1>
    %18 = vector.broadcast %6 : i32 to vector<128x32xi32>
    %19 = arith.addi %8, %18 : vector<128x32xi32>
    %20 = arith.select %17, %19, %8 : vector<128x32xi1>, vector<128x32xi32>
    %cst = arith.constant 0.000000e+00 : f32
    %21 = vector.broadcast %cst : f32 to vector<128x32xf32>
    %c0_i32_5 = arith.constant 0 : i32
    %22 = arith.addi %3, %c0_i32_5 : i32
    %c1_i32_6 = arith.constant 1 : i32
    %23 = arith.addi %22, %c1_i32_6 : i32
    %c16_i32_7 = arith.constant 16 : i32
    %24 = arith.muli %23, %c16_i32_7 : i32
    %25 = tpu.assume_multiple %24, 16 : i32
    %c1_i32_8 = arith.constant 1 : i32
    %26 = arith.subi %25, %c1_i32_8 : i32
    %27 = arith.index_cast %26 : i32 to index
    %c0 = arith.constant 0 : index
    %28 = vector.load %arg10[%27, %c0] : memref<320x32xf32, #tpu.memory_space<vmem>>, vector<128x32xf32>
    %29 = arith.index_cast %25 : i32 to index
    %c0_9 = arith.constant 0 : index
    %30 = vector.load %arg10[%29, %c0_9] : memref<320x32xf32, #tpu.memory_space<vmem>>, vector<128x32xf32>
    %c1_i32_10 = arith.constant 1 : i32
    %31 = arith.addi %25, %c1_i32_10 : i32
    %32 = arith.index_cast %31 : i32 to index
    %c0_11 = arith.constant 0 : index
    %33 = vector.load %arg10[%32, %c0_11] : memref<320x32xf32, #tpu.memory_space<vmem>>, vector<128x32xf32>
    %c0_i32_12 = arith.constant 0 : i32
    %34 = vector.broadcast %c0_i32_12 : i32 to vector<128x32xi32>
    %35 = arith.cmpi eq, %20, %34 : vector<128x32xi32>
    %cst_13 = arith.constant 0.000000e+00 : f32
    %36 = vector.broadcast %cst_13 : f32 to vector<128x32xf32>
    %37 = arith.select %35, %36, %28 : vector<128x32xi1>, vector<128x32xf32>
    %c15_i32 = arith.constant 15 : i32
    %38 = vector.broadcast %c15_i32 : i32 to vector<128x32xi32>
    %39 = arith.cmpi eq, %20, %38 : vector<128x32xi32>
    %cst_14 = arith.constant 0.000000e+00 : f32
    %40 = vector.broadcast %cst_14 : f32 to vector<128x32xf32>
    %41 = arith.select %39, %40, %33 : vector<128x32xi1>, vector<128x32xf32>
    %42 = tpu.concatenate %37, %30, %41 in 1 : vector<128x32xf32>, vector<128x32xf32>, vector<128x32xf32> -> vector<128x96xf32>
    %43 = arith.truncf %42 : vector<128x96xf32> to vector<128x96xbf16>
    %c0_15 = arith.constant 0 : index
    %c0_16 = arith.constant 0 : index
    %c0_17 = arith.constant 0 : index
    %44 = vector.load %arg4[%c0_15, %c0_16, %c0_17] : memref<3x96x32xbf16, #tpu.memory_space<vmem>>, vector<1x96x32xbf16>
    %45 = vector.shape_cast %44 : vector<1x96x32xbf16> to vector<96x32xbf16>
    %cst_18 = arith.constant dense<0.000000e+00> : vector<128x32xf32>
    %46 = tpu.matmul %43, %45, %cst_18 {dimension_numbers = #tpu.dot_dimension_numbers<[1], [0], [0], [1], [0, 0, 1, 1], [], []>} : vector<128x96xbf16>, vector<96x32xbf16>, vector<128x32xf32> -> vector<128x32xf32>
    %47 = arith.addf %21, %46 : vector<128x32xf32>
    %c1_i32_19 = arith.constant 1 : i32
    %48 = arith.addi %3, %c1_i32_19 : i32
    %c1_i32_20 = arith.constant 1 : i32
    %49 = arith.addi %48, %c1_i32_20 : i32
    %c16_i32_21 = arith.constant 16 : i32
    %50 = arith.muli %49, %c16_i32_21 : i32
    %51 = tpu.assume_multiple %50, 16 : i32
    %c1_i32_22 = arith.constant 1 : i32
    %52 = arith.subi %51, %c1_i32_22 : i32
    %53 = arith.index_cast %52 : i32 to index
    %c0_23 = arith.constant 0 : index
    %54 = vector.load %arg10[%53, %c0_23] : memref<320x32xf32, #tpu.memory_space<vmem>>, vector<128x32xf32>
    %55 = arith.index_cast %51 : i32 to index
    %c0_24 = arith.constant 0 : index
    %56 = vector.load %arg10[%55, %c0_24] : memref<320x32xf32, #tpu.memory_space<vmem>>, vector<128x32xf32>
    %c1_i32_25 = arith.constant 1 : i32
    %57 = arith.addi %51, %c1_i32_25 : i32
    %58 = arith.index_cast %57 : i32 to index
    %c0_26 = arith.constant 0 : index
    %59 = vector.load %arg10[%58, %c0_26] : memref<320x32xf32, #tpu.memory_space<vmem>>, vector<128x32xf32>
    %c0_i32_27 = arith.constant 0 : i32
    %60 = vector.broadcast %c0_i32_27 : i32 to vector<128x32xi32>
    %61 = arith.cmpi eq, %20, %60 : vector<128x32xi32>
    %cst_28 = arith.constant 0.000000e+00 : f32
    %62 = vector.broadcast %cst_28 : f32 to vector<128x32xf32>
    %63 = arith.select %61, %62, %54 : vector<128x32xi1>, vector<128x32xf32>
    %c15_i32_29 = arith.constant 15 : i32
    %64 = vector.broadcast %c15_i32_29 : i32 to vector<128x32xi32>
    %65 = arith.cmpi eq, %20, %64 : vector<128x32xi32>
    %cst_30 = arith.constant 0.000000e+00 : f32
    %66 = vector.broadcast %cst_30 : f32 to vector<128x32xf32>
    %67 = arith.select %65, %66, %59 : vector<128x32xi1>, vector<128x32xf32>
    %68 = tpu.concatenate %63, %56, %67 in 1 : vector<128x32xf32>, vector<128x32xf32>, vector<128x32xf32> -> vector<128x96xf32>
    %69 = arith.truncf %68 : vector<128x96xf32> to vector<128x96xbf16>
    %c1 = arith.constant 1 : index
    %c0_31 = arith.constant 0 : index
    %c0_32 = arith.constant 0 : index
    %70 = vector.load %arg4[%c1, %c0_31, %c0_32] : memref<3x96x32xbf16, #tpu.memory_space<vmem>>, vector<1x96x32xbf16>
    %71 = vector.shape_cast %70 : vector<1x96x32xbf16> to vector<96x32xbf16>
    %cst_33 = arith.constant dense<0.000000e+00> : vector<128x32xf32>
    %72 = tpu.matmul %69, %71, %cst_33 {dimension_numbers = #tpu.dot_dimension_numbers<[1], [0], [0], [1], [0, 0, 1, 1], [], []>} : vector<128x96xbf16>, vector<96x32xbf16>, vector<128x32xf32> -> vector<128x32xf32>
    %73 = arith.addf %47, %72 : vector<128x32xf32>
    %c2_i32 = arith.constant 2 : i32
    %74 = arith.addi %3, %c2_i32 : i32
    %c1_i32_34 = arith.constant 1 : i32
    %75 = arith.addi %74, %c1_i32_34 : i32
    %c16_i32_35 = arith.constant 16 : i32
    %76 = arith.muli %75, %c16_i32_35 : i32
    %77 = tpu.assume_multiple %76, 16 : i32
    %c1_i32_36 = arith.constant 1 : i32
    %78 = arith.subi %77, %c1_i32_36 : i32
    %79 = arith.index_cast %78 : i32 to index
    %c0_37 = arith.constant 0 : index
    %80 = vector.load %arg10[%79, %c0_37] : memref<320x32xf32, #tpu.memory_space<vmem>>, vector<128x32xf32>
    %81 = arith.index_cast %77 : i32 to index
    %c0_38 = arith.constant 0 : index
    %82 = vector.load %arg10[%81, %c0_38] : memref<320x32xf32, #tpu.memory_space<vmem>>, vector<128x32xf32>
    %c1_i32_39 = arith.constant 1 : i32
    %83 = arith.addi %77, %c1_i32_39 : i32
    %84 = arith.index_cast %83 : i32 to index
    %c0_40 = arith.constant 0 : index
    %85 = vector.load %arg10[%84, %c0_40] : memref<320x32xf32, #tpu.memory_space<vmem>>, vector<128x32xf32>
    %c0_i32_41 = arith.constant 0 : i32
    %86 = vector.broadcast %c0_i32_41 : i32 to vector<128x32xi32>
    %87 = arith.cmpi eq, %20, %86 : vector<128x32xi32>
    %cst_42 = arith.constant 0.000000e+00 : f32
    %88 = vector.broadcast %cst_42 : f32 to vector<128x32xf32>
    %89 = arith.select %87, %88, %80 : vector<128x32xi1>, vector<128x32xf32>
    %c15_i32_43 = arith.constant 15 : i32
    %90 = vector.broadcast %c15_i32_43 : i32 to vector<128x32xi32>
    %91 = arith.cmpi eq, %20, %90 : vector<128x32xi32>
    %cst_44 = arith.constant 0.000000e+00 : f32
    %92 = vector.broadcast %cst_44 : f32 to vector<128x32xf32>
    %93 = arith.select %91, %92, %85 : vector<128x32xi1>, vector<128x32xf32>
    %94 = tpu.concatenate %89, %82, %93 in 1 : vector<128x32xf32>, vector<128x32xf32>, vector<128x32xf32> -> vector<128x96xf32>
    %95 = arith.truncf %94 : vector<128x96xf32> to vector<128x96xbf16>
    %c2 = arith.constant 2 : index
    %c0_45 = arith.constant 0 : index
    %c0_46 = arith.constant 0 : index
    %96 = vector.load %arg4[%c2, %c0_45, %c0_46] : memref<3x96x32xbf16, #tpu.memory_space<vmem>>, vector<1x96x32xbf16>
    %97 = vector.shape_cast %96 : vector<1x96x32xbf16> to vector<96x32xbf16>
    %cst_47 = arith.constant dense<0.000000e+00> : vector<128x32xf32>
    %98 = tpu.matmul %95, %97, %cst_47 {dimension_numbers = #tpu.dot_dimension_numbers<[1], [0], [0], [1], [0, 0, 1, 1], [], []>} : vector<128x96xbf16>, vector<96x32xbf16>, vector<128x32xf32> -> vector<128x32xf32>
    %99 = arith.addf %73, %98 : vector<128x32xf32>
    %c0_48 = arith.constant 0 : index
    %c0_49 = arith.constant 0 : index
    %100 = vector.load %arg7[%c0_48, %c0_49] : memref<1x32xf32, #tpu.memory_space<vmem>>, vector<1x32xf32>
    %101 = vector.broadcast %100 : vector<1x32xf32> to vector<128x32xf32>
    %102 = arith.addf %99, %101 : vector<128x32xf32>
    %cst_50 = arith.constant 0.000000e+00 : f32
    %103 = vector.broadcast %cst_50 : f32 to vector<128x32xf32>
    %104 = arith.maximumf %102, %103 : vector<128x32xf32>
    %105 = arith.truncf %104 : vector<128x32xf32> to vector<128x32xbf16>
    %c0_51 = arith.constant 0 : index
    %c0_52 = arith.constant 0 : index
    %106 = vector.load %arg5[%c0_51, %c0_52] : memref<32x128xbf16, #tpu.memory_space<vmem>>, vector<32x128xbf16>
    %cst_53 = arith.constant dense<0.000000e+00> : vector<128x128xf32>
    %107 = tpu.matmul %105, %106, %cst_53 {dimension_numbers = #tpu.dot_dimension_numbers<[1], [0], [0], [1], [0, 0, 1, 1], [], []>} : vector<128x32xbf16>, vector<32x128xbf16>, vector<128x128xf32> -> vector<128x128xf32>
    %c0_54 = arith.constant 0 : index
    %108 = arith.index_cast %3 : i32 to index
    %c0_55 = arith.constant 0 : index
    %c0_56 = arith.constant 0 : index
    %109 = vector.load %arg2[%c0_54, %108, %c0_55, %c0_56] : memref<1x16x16x128xbf16, #tpu.memory_space<vmem>>, vector<1x8x16x128xbf16>
    %110 = vector.shape_cast %109 : vector<1x8x16x128xbf16> to vector<128x128xbf16>
    %111 = arith.extf %110 : vector<128x128xbf16> to vector<128x128xf32>
    %c0_57 = arith.constant 0 : index
    %c0_58 = arith.constant 0 : index
    %112 = vector.load %arg8[%c0_57, %c0_58] : memref<1x128xf32, #tpu.memory_space<vmem>>, vector<1x128xf32>
    %113 = vector.broadcast %112 : vector<1x128xf32> to vector<128x128xf32>
    %114 = arith.addf %107, %113 : vector<128x128xf32>
    %115 = arith.addf %114, %111 : vector<128x128xf32>
    %cst_59 = arith.constant 0.000000e+00 : f32
    %116 = vector.broadcast %cst_59 : f32 to vector<128x128xf32>
    %117 = arith.maximumf %115, %116 : vector<128x128xf32>
    %118 = vector.shape_cast %117 : vector<128x128xf32> to vector<1x8x16x128xf32>
    %c0_60 = arith.constant 0 : index
    %c0_61 = arith.constant 0 : index
    %c0_62 = arith.constant 0 : index
    %c0_63 = arith.constant 0 : index
    %119 = vector.load %arg9[%c0_60, %c0_61, %c0_62, %c0_63] : memref<1x8x16x128xf32, #tpu.memory_space<vmem>>, vector<1x8x16x128xf32>
    tpu.vector_store %arg9[%c0_60, %c0_61, %c0_62, %c0_63], %118 {strides = array<i32>} : memref<1x8x16x128xf32, #tpu.memory_space<vmem>>, vector<1x8x16x128xf32>,
    return
  }
  func.func @transform_0(%arg0: i32, %arg1: i32) -> (i32, i32, i32, i32) {
    %c0_i32 = arith.constant 0 : i32
    %c0_i32_0 = arith.constant 0 : i32
    %c0_i32_1 = arith.constant 0 : i32
    %c0_i32_2 = arith.constant 0 : i32
    return %arg0, %c0_i32, %c0_i32_0, %c0_i32_1 : i32, i32, i32, i32
  }
  func.func @transform_1(%arg0: i32, %arg1: i32) -> (i32, i32) {
    %c0_i32 = arith.constant 0 : i32
    %c0_i32_0 = arith.constant 0 : i32
    %c0_i32_1 = arith.constant 0 : i32
    return %c0_i32, %c0_i32_0 : i32, i32
  }
  func.func @transform_2(%arg0: i32, %arg1: i32) -> (i32, i32, i32) {
    %c0_i32 = arith.constant 0 : i32
    %c0_i32_0 = arith.constant 0 : i32
    %c0_i32_1 = arith.constant 0 : i32
    %c0_i32_2 = arith.constant 0 : i32
    return %c0_i32, %c0_i32_0, %c0_i32_1 : i32, i32, i32
  }
  func.func @transform_3(%arg0: i32, %arg1: i32) -> (i32, i32) {
    %c0_i32 = arith.constant 0 : i32
    %c0_i32_0 = arith.constant 0 : i32
    %c0_i32_1 = arith.constant 0 : i32
    return %c0_i32, %c0_i32_0 : i32, i32
  }
  func.func @transform_4(%arg0: i32, %arg1: i32) -> (i32, i32) {
    %c0_i32 = arith.constant 0 : i32
    %c0_i32_0 = arith.constant 0 : i32
    %c0_i32_1 = arith.constant 0 : i32
    return %c0_i32, %c0_i32_0 : i32, i32
  }
  func.func @transform_5(%arg0: i32, %arg1: i32) -> (i32, i32) {
    %c0_i32 = arith.constant 0 : i32
    %c0_i32_0 = arith.constant 0 : i32
    %c0_i32_1 = arith.constant 0 : i32
    return %c0_i32, %c0_i32_0 : i32, i32
  }
  func.func @transform_6(%arg0: i32, %arg1: i32) -> (i32, i32) {
    %c0_i32 = arith.constant 0 : i32
    %c0_i32_0 = arith.constant 0 : i32
    %c0_i32_1 = arith.constant 0 : i32
    return %c0_i32, %c0_i32_0 : i32, i32
  }
  func.func @transform_7(%arg0: i32, %arg1: i32) -> (i32, i32, i32, i32) {
    %c0_i32 = arith.constant 0 : i32
    %c0_i32_0 = arith.constant 0 : i32
    %c0_i32_1 = arith.constant 0 : i32
    return %arg0, %arg1, %c0_i32, %c0_i32_0 : i32, i32, i32, i32
  }
}

</mosaic_0001>

<bundles_post_ra>
// kernel: tpu_custom_call.1
= control target key start
LH: loop header
LB: loop body
LE: loop exit
PB: predicated region body
PF: predicated region fallthrough
CT: control target
= control target key end

     0   :  { %12 = vsyncpa [#allocation4], 0  ;;  %s4847_s0 = inlined_call_operand.vmem [shape: bf16[2,16,16,128], index: 0, kind: input, shape index: {}]   ;;  %s4848_s1 = inlined_call_operand.vmem [shape: bf16[128,32], index: 1, kind: input, shape index: {}]   ;;  %s4849_s2 = inlined_call_operand.vmem [shape: bf16[3,96,32], index: 2, kind: input, shape index: {}]   ;;  %s4850_s3 = inlined_call_operand.vmem [shape: bf16[32,128], index: 3, kind: input, shape index: {}]   ;;  %s4851_s4 = inlined_call_operand.vmem [shape: f32[1,32], index: 4, kind: input, shape index: {}]   ;;  %s4852_s5 = inlined_call_operand.vmem [shape: f32[1,32], index: 5, kind: input, shape index: {}]   ;;  %s4853_s6 = inlined_call_operand.vmem [shape: f32[1,128], index: 6, kind: input, shape index: {}]   ;;  %s4854_s7 = inlined_call_operand.hbm [shape: f32[2,16,16,128], index: 7, kind: output, shape index: {}]  }
   0x1   :  { %14 = vsyncpa [#allocation4 + $0x1], 0  ;;  %s3825_s24 = smov 0   ;;  %s3827_s25 = smov 0  }
   0x2   :  { %s3829_s26 = smov 0   ;;  %s3831_s27 = smov 0  }
   0x3   :  { %s3833_s28 = smov 0   ;;  %s3835_s29 = smov 0  }
   0x4   :  { %s3837_s30 = smov 0   ;;  %s3839_s8 = smov 0  }
   0x5 LB: > { %s2693_s9 = sadd.s32 4294967295, %s3777_s8   ;;  %s2694_s10 = sadd.s32 4294967294, %s3777_s8   ;;  %s3777_s8 = sphi %s3839_s8, %s20_s8   ;;  %s3773_s30 = sphi %s3837_s30, %s4901_s30   ;;  %s3769_s29 = sphi %s3835_s29, %s4900_s29   ;;  %s3765_s28 = sphi %s3833_s28, %s4899_s28   ;;  %s3761_s27 = sphi %s3831_s27, %s4898_s27   ;;  %s3757_s26 = sphi %s3829_s26, %s4897_s26   ;;  %s3753_s25 = sphi %s3827_s25, %s4896_s25   ;;  %s3749_s24 = sphi %s3825_s24, %s4895_s24  }
   0x6   : > { %s29_s11 = sadd.s32 1, %s3769_s29  ;;  %s32_s12 = sadd.s32 1, %s3773_s30 }
   0x7   : > { %p30_p0 = scmp.ge.s32.totalorder %s29_s11, 2  ;;  %p203_p1 = scmp.ne.s32.totalorder %s3757_s26, %s3753_s25 }
   0x8   : > { %p204_p2 = scmp.eq.s32.totalorder %s2693_s9, 3  ;;  %p209_p5 = scmp.ne.s32.totalorder %s3753_s25, %s3749_s24 }
   0x9   : > { %s4903_s11 = smov (%p30_p0, %s29_s11), 0  ;;  %s4905_s12 = smov (!%p30_p0, %s32_s12), %s3773_s30 }
   0xa   : > { %4857 = sst [smem:[#allocation6_spill]] %s4903_s11  ;;  %s189_s13 = ssub.s32 %s3769_s29, %s4903_s11 }
   0xb   : > { %p3876_p3 = por %p204_p2, %p203_p1  ;;  %p34_p4 = scmp.ge.s32.totalorder %s4905_s12, 2 }
   0xc   : > { %p210_p6 = scmp.eq.s32.totalorder %s2694_s10, 3  ;;  %p2697_p7 = scmp.ge.s32.totalorder %s3777_s8, 1 }
   0xd   : > { %s4907_s12 = smov (%p34_p4, %s4905_s12), 0  ;;  %p254_p9 = scmp.lt.s32.totalorder %s3777_s8, 5 }
   0xe   : > { %4859 = sst [smem:[#allocation7_spill]] %s4907_s12  ;;  %p3885_p8 = por %p210_p6, %p209_p5 }
   0xf   : > { %s188_s16 = ssub.s32 %s3773_s30, %s4907_s12  ;;  %s193_s17 = sadd.s32 1, %s3757_s26 }
  0x10   : > { %s190_s18 = sor.u32 %s189_s13, %s188_s16  ;;  %p255_p10 = pnand %p2697_p7, %p254_p9 }
  0x11   : > { %p191_p11 = scmp.eq.s32.totalorder %s190_s18, 0  ;;  %s283_s20 = sand.u32 (!%p255_p10), 1, %s3753_s25  }
  0x12   : > { %258 = sbr.rel (%p255_p10) target bundleno = 985 (0x3d9), region = 48  ;;  %p286_p12 = scmp.lt.s32.totalorder (!%p255_p10), %s3765_s28, 1 }
  0x13   : > { %s3894_s19 = scalar_select %p191_p11, %s3757_s26, %s193_s17  }
  0x14   : > { %s2698_s21 = sshll.u32 (!%p255_p10), %s283_s20, 7  ;;  %p2701_p13 = scmp.ne.s32.totalorder (!%p255_p10), %s3761_s27, 0 }
  0x15   : > { %s3906_s13 = scalar_lea.vmem (!%p255_p10), [#allocation3], %s2698_s21 }
  0x19   : > { %s287_s22 = scalar_select %p286_p12, %s3765_s28, 1 }
  0x1a   : > { %296 = sbr.rel (%p2701_p13) target bundleno = 303 (0x12f), region = 52  ;;  %v3399_v0 = vld [vmem:[%s4848_s1] sm:$0xff] (!%p2701_p13)   ;;  %vm297_vm0 = vcmask (!%p2701_p13), 261120   ;;  %v3400_v1 = vld [vmem:[%s4848_s1 + $0x8] sm:$0xff] (!%p2701_p13)   ;;  %v3779_v2 = vmov (!%p2701_p13), 0.0   ;;  %v3401_v3 = vld [vmem:[%s4848_s1 + $0x10] sm:$0xff] (!%p2701_p13)  }
  0x1b   : > { %s2932_s23 = sshll.u32 %s287_s22, 7  ;;  %3123 = vmatprep.subr.bf16.mxu0 (!%p2701_p13), %v3399_v0  ;;  %3275 = vmatprep.subr.bf16.mxu1 (!%p2701_p13), %v3399_v0  ;;  %298 = vst.msk [vmem:[#allocation2] sm:$0xff] (!%p2701_p13), %vm297_vm0, %v3779_v2  ;;  %299 = vst.msk [vmem:[#allocation2 + $0x8] sm:$0xff] (!%p2701_p13), %vm297_vm0, %v3779_v2  ;;  %v3402_v4 = vld [vmem:[%s4848_s1 + $0x18] sm:$0xff] (!%p2701_p13)   ;;  %v3403_v7 = vld [vmem:[%s4848_s1 + $0x20] sm:$0xff] (!%p2701_p13)  }
  0x1c   : > { %s3904_s12 = scalar_lea.vmem %s4847_s0, %s2932_s23  ;;  %300 = vst.msk [vmem:[#allocation2 + $0x10] sm:$0xff] (!%p2701_p13), %vm297_vm0, %v3779_v2  ;;  %301 = vst.msk [vmem:[#allocation2 + $0x18] sm:$0xff] (!%p2701_p13), %vm297_vm0, %v3779_v2  ;;  %3124 = vmatpush3.bf16.msra.mxu0 (!%p2701_p13), %v3399_v0  ;;  %3283 = vmatpush3.bf16.msra.mxu1 (!%p2701_p13), %v3399_v0  ;;  %v3404_v8 = vld [vmem:[%s4848_s1 + $0x28] sm:$0xff] (!%p2701_p13)   ;;  %v3405_v9 = vld [vmem:[%s4848_s1 + $0x30] sm:$0xff] (!%p2701_p13)  }
  0x1d   : > { %304 = vst.msk [vmem:[#allocation2 + $0x30] sm:$0xff] (!%p2701_p13), %vm297_vm0, %v3779_v2  ;;  %334 = vst.msk [vmem:[#allocation2 + $0x120] sm:$0xff] (!%p2701_p13), %vm297_vm0, %v3779_v2  ;;  %3125 = vmatprep.subr.bf16.mxu0 (!%p2701_p13), %v3400_v1  ;;  %3276 = vmatprep.subr.bf16.mxu1 (!%p2701_p13), %v3400_v1  ;;  %v3407_v5 = vld [vmem:[%s3904_s12] sm:$0xff] (!%p2701_p13)   ;;  %v3406_v10 = vld [vmem:[%s4848_s1 + $0x38] sm:$0xff] (!%p2701_p13)  }
  0x1e   : > { %335 = vst.msk [vmem:[#allocation2 + $0x128] sm:$0xff] (!%p2701_p13), %vm297_vm0, %v3779_v2  ;;  %336 = vst.msk [vmem:[#allocation2 + $0x130] sm:$0xff] (!%p2701_p13), %vm297_vm0, %v3779_v2  ;;  %v3408_v6 = vld [vmem:[%s3904_s12 + $0x40] sm:$0xff] (!%p2701_p13)   ;;  %3139 = vmatprep.mubr.bf16.mxu0 (!%p2701_p13), %v3407_v5  ;;  %v3409_v11 = vld [vmem:[%s3904_s12 + $0x8] sm:$0xff] (!%p2701_p13)  }
  0x1f   : > { %337 = vst.msk [vmem:[#allocation2 + $0x138] sm:$0xff] (!%p2701_p13), %vm297_vm0, %v3779_v2  ;;  %302 = vst.msk [vmem:[#allocation2 + $0x20] sm:$0xff] (!%p2701_p13), %vm297_vm0, %v3779_v2  ;;  %3155 = vmatprep.mubr.bf16.mxu1 (!%p2701_p13), %v3408_v6  ;;  %v3410_v12 = vld [vmem:[%s3904_s12 + $0x48] sm:$0xff] (!%p2701_p13)   ;;  %v3411_v13 = vld [vmem:[%s3904_s12 + $0x10] sm:$0xff] (!%p2701_p13)  }
  0x20   : > { %303 = vst.msk [vmem:[#allocation2 + $0x28] sm:$0xff] (!%p2701_p13), %vm297_vm0, %v3779_v2  ;;  %305 = vst.msk [vmem:[#allocation2 + $0x38] sm:$0xff] (!%p2701_p13), %vm297_vm0, %v3779_v2  ;;  %3126 = vmatpush3.bf16.msra.mxu0 (!%p2701_p13), %v3400_v1  ;;  %3284 = vmatpush3.bf16.msra.mxu1 (!%p2701_p13), %v3400_v1  ;;  %v3412_v14 = vld [vmem:[%s3904_s12 + $0x50] sm:$0xff] (!%p2701_p13)   ;;  %v3413_v15 = vld [vmem:[%s3904_s12 + $0x18] sm:$0xff] (!%p2701_p13)  }
  0x21   : > { %306 = vst.msk [vmem:[#allocation2 + $0x40] sm:$0xff] %vm297_vm0, %v3779_v2  ;;  %307 = vst.msk [vmem:[#allocation2 + $0x48] sm:$0xff] %vm297_vm0, %v3779_v2  ;;  %3127 = vmatprep.subr.bf16.mxu0 %v3401_v3  ;;  %3277 = vmatprep.subr.bf16.mxu1 %v3401_v3  ;;  %v3414_v16 = vld [vmem:[%s3904_s12 + $0x58] sm:$0xff]   ;;  %v3415_v17 = vld [vmem:[%s3904_s12 + $0x20] sm:$0xff]  }
  0x22   : > { %308 = vst.msk [vmem:[#allocation2 + $0x50] sm:$0xff] %vm297_vm0, %v3779_v2  ;;  %309 = vst.msk [vmem:[#allocation2 + $0x58] sm:$0xff] %vm297_vm0, %v3779_v2  ;;  %v3416_v18 = vld [vmem:[%s3904_s12 + $0x60] sm:$0xff]   ;;  %v3417_v19 = vld [vmem:[%s3904_s12 + $0x28] sm:$0xff]  }
  0x23   : > { %310 = vst.msk [vmem:[#allocation2 + $0x60] sm:$0xff] %vm297_vm0, %v3779_v2  ;;  %311 = vst.msk [vmem:[#allocation2 + $0x68] sm:$0xff] %vm297_vm0, %v3779_v2  ;;  %v3418_v20 = vld [vmem:[%s3904_s12 + $0x68] sm:$0xff]   ;;  %v3419_v21 = vld [vmem:[%s3904_s12 + $0x30] sm:$0xff]  }
  0x24   : > { %312 = vst.msk [vmem:[#allocation2 + $0x70] sm:$0xff] %vm297_vm0, %v3779_v2  ;;  %313 = vst.msk [vmem:[#allocation2 + $0x78] sm:$0xff] %vm297_vm0, %v3779_v2  ;;  %3128 = vmatpush3.bf16.msra.mxu0 %v3401_v3  ;;  %3285 = vmatpush3.bf16.msra.mxu1 %v3401_v3  ;;  %v3420_v22 = vld [vmem:[%s3904_s12 + $0x70] sm:$0xff]   ;;  %v3421_v23 = vld [vmem:[%s3904_s12 + $0x38] sm:$0xff]  }
  0x25   : > { %314 = vst.msk [vmem:[#allocation2 + $0x80] sm:$0xff] %vm297_vm0, %v3779_v2  ;;  %315 = vst.msk [vmem:[#allocation2 + $0x88] sm:$0xff] %vm297_vm0, %v3779_v2  ;;  %3129 = vmatprep.subr.bf16.mxu0 %v3402_v4  ;;  %3278 = vmatprep.subr.bf16.mxu1 %v3402_v4  ;;  %v3422_v24 = vld [vmem:[%s3904_s12 + $0x78] sm:$0xff]   ;;  %v3992_v25 = vld [vmem:[%s4851_s4] ss:$0 sm:$0xff] }
  0x26   : > { %316 = vst.msk [vmem:[#allocation2 + $0x90] sm:$0xff] %vm297_vm0, %v3779_v2  ;;  %317 = vst.msk [vmem:[#allocation2 + $0x98] sm:$0xff] %vm297_vm0, %v3779_v2 }
  0x27   : > { %318 = vst.msk [vmem:[#allocation2 + $0xa0] sm:$0xff] %vm297_vm0, %v3779_v2  ;;  %319 = vst.msk [vmem:[#allocation2 + $0xa8] sm:$0xff] %vm297_vm0, %v3779_v2 }
  0x28   : > { %320 = vst.msk [vmem:[#allocation2 + $0xb0] sm:$0xff] %vm297_vm0, %v3779_v2  ;;  %321 = vst.msk [vmem:[#allocation2 + $0xb8] sm:$0xff] %vm297_vm0, %v3779_v2  ;;  %3130 = vmatpush3.bf16.msra.mxu0 %v3402_v4  ;;  %3286 = vmatpush3.bf16.msra.mxu1 %v3402_v4 }
  0x29   : > { %322 = vst.msk [vmem:[#allocation2 + $0xc0] sm:$0xff] %vm297_vm0, %v3779_v2  ;;  %323 = vst.msk [vmem:[#allocation2 + $0xc8] sm:$0xff] %vm297_vm0, %v3779_v2  ;;  %3131 = vmatprep.subr.bf16.mxu0 %v3403_v7  ;;  %3279 = vmatprep.subr.bf16.mxu1 %v3403_v7 }
  0x2a   : > { %324 = vst.msk [vmem:[#allocation2 + $0xd0] sm:$0xff] %vm297_vm0, %v3779_v2  ;;  %325 = vst.msk [vmem:[#allocation2 + $0xd8] sm:$0xff] %vm297_vm0, %v3779_v2 }
  0x2b   : > { %326 = vst.msk [vmem:[#allocation2 + $0xe0] sm:$0xff] %vm297_vm0, %v3779_v2  ;;  %327 = vst.msk [vmem:[#allocation2 + $0xe8] sm:$0xff] %vm297_vm0, %v3779_v2 }
  0x2c   : > { %328 = vst.msk [vmem:[#allocation2 + $0xf0] sm:$0xff] %vm297_vm0, %v3779_v2  ;;  %329 = vst.msk [vmem:[#allocation2 + $0xf8] sm:$0xff] %vm297_vm0, %v3779_v2  ;;  %3132 = vmatpush3.bf16.msra.mxu0 %v3403_v7  ;;  %3287 = vmatpush3.bf16.msra.mxu1 %v3403_v7 }
  0x2d   : > { %330 = vst.msk [vmem:[#allocation2 + $0x100] sm:$0xff] %vm297_vm0, %v3779_v2  ;;  %331 = vst.msk [vmem:[#allocation2 + $0x108] sm:$0xff] %vm297_vm0, %v3779_v2  ;;  %3133 = vmatprep.subr.bf16.mxu0 %v3404_v8  ;;  %3280 = vmatprep.subr.bf16.mxu1 %v3404_v8 }
  0x2e   : > { %332 = vst.msk [vmem:[#allocation2 + $0x110] sm:$0xff] %vm297_vm0, %v3779_v2  ;;  %333 = vst.msk [vmem:[#allocation2 + $0x118] sm:$0xff] %vm297_vm0, %v3779_v2 }
  0x30   : > { %3134 = vmatpush3.bf16.msra.mxu0 %v3404_v8  ;;  %3288 = vmatpush3.bf16.msra.mxu1 %v3404_v8 }
  0x31   : > { %3135 = vmatprep.subr.bf16.mxu0 %v3405_v9  ;;  %3281 = vmatprep.subr.bf16.mxu1 %v3405_v9 }
  0x34   : > { %3136 = vmatpush3.bf16.msra.mxu0 %v3405_v9  ;;  %3289 = vmatpush3.bf16.msra.mxu1 %v3405_v9 }
  0x35   : > { %3137 = vmatprep.subr.bf16.mxu0 %v3406_v10  ;;  %3282 = vmatprep.subr.bf16.mxu1 %v3406_v10 }
  0x38   : > { %3138 = vmatpush3.bf16.msra.mxu0 %v3406_v10  ;;  %3290 = vmatpush3.bf16.msra.mxu1 %v3406_v10 }
  0x3b   : > { %3140 = vmatmul.mubr.bf16.vlgmr.msra.gmra.mrb[0].mxu0 %v3409_v11  ;;  %3156 = vmatmul.mubr.bf16.vlgmr.msra.gmra.mrb[0].mxu1 %v3410_v12 }
  0x3c   : > { %3143 = vmatprep.mubr.bf16.mxu0 %v3411_v13  ;;  %3159 = vmatprep.mubr.bf16.mxu1 %v3412_v14 }
  0x43   : > { %3144 = vmatmul.mubr.bf16.gmra.mrb[4].mxu0 %v3413_v15  ;;  %3160 = vmatmul.mubr.bf16.gmra.mrb[4].mxu1 %v3414_v16 }
  0x44   : > { %3147 = vmatprep.mubr.bf16.mxu0 %v3415_v17  ;;  %3163 = vmatprep.mubr.bf16.mxu1 %v3416_v18 }
  0x4b   : > { %3148 = vmatmul.mubr.bf16.gmra.mrb[8].mxu0 %v3417_v19  ;;  %3164 = vmatmul.mubr.bf16.gmra.mrb[8].mxu1 %v3418_v20 }
  0x4c   : > { %3151 = vmatprep.mubr.bf16.mxu0 %v3419_v21  ;;  %3167 = vmatprep.mubr.bf16.mxu1 %v3420_v22 }
  0x53   : > { %3152 = vmatmul.mubr.bf16.gmra.mrb[12].mxu0 %v3421_v23  ;;  %3168 = vmatmul.mubr.bf16.gmra.mrb[12].mxu1 %v3422_v24 }
 0x10e   : > { %v3141_v26 = vpop.f32.mrb[0].mxu0  ;;  %v3157_v27 = vpop.f32.mrb[0].mxu1 }
 0x10f   : > { %v580_v28 = vadd.f32 %v3141_v26, %v3992_v25  ;;  %v644_v29 = vadd.f32 %v3157_v27, %v3992_v25  ;;  %v571_v30 = vpop.f32.mrb[1].mxu0  ;;  %v635_v31 = vpop.f32.mrb[1].mxu1 }
 0x110   : > { %v572_v32 = vadd.f32 %v3992_v25, %v571_v30  ;;  %v636_v33 = vadd.f32 %v3992_v25, %v635_v31  ;;  %v3142_v34 = vpop.f32.mrb[2].mxu0  ;;  %v3158_v35 = vpop.f32.mrb[2].mxu1 }
 0x111   : > { %v700_v36 = vmax.f32 %v580_v28, 0.0  ;;  %v716_v37 = vmax.f32 %v644_v29, 0.0  ;;  %v583_v38 = vadd.f32 %v3142_v34, %v3992_v25  ;;  %v647_v39 = vadd.f32 %v3158_v35, %v3992_v25  ;;  %v574_v40 = vpop.f32.mrb[3].mxu0  ;;  %v638_v41 = vpop.f32.mrb[3].mxu1 }
 0x112   : > { %v698_v42 = vmax.f32 %v572_v32, 0.0  ;;  %v714_v43 = vmax.f32 %v636_v33, 0.0  ;;  %v575_v44 = vadd.f32 %v3992_v25, %v574_v40  ;;  %v639_v45 = vadd.f32 %v3992_v25, %v638_v41 }
 0x113   : > { %732 = vst.msk [vmem:[#allocation2 + $0x30] sm:$0xff] %vm297_vm0, %v700_v36  ;;  %748 = vst.msk [vmem:[#allocation2 + $0xb0] sm:$0xff] %vm297_vm0, %v716_v37  ;;  %v701_v46 = vmax.f32 %v583_v38, 0.0  ;;  %v717_v47 = vmax.f32 %v647_v39, 0.0 }
 0x114   : > { %730 = vst.msk [vmem:[#allocation2 + $0x20] sm:$0xff] %vm297_vm0, %v698_v42  ;;  %746 = vst.msk [vmem:[#allocation2 + $0xa0] sm:$0xff] %vm297_vm0, %v714_v43  ;;  %v699_v48 = vmax.f32 %v575_v44, 0.0  ;;  %v715_v49 = vmax.f32 %v639_v45, 0.0 }
 0x115   : > { %733 = vst.msk [vmem:[#allocation2 + $0x38] sm:$0xff] %vm297_vm0, %v701_v46  ;;  %749 = vst.msk [vmem:[#allocation2 + $0xb8] sm:$0xff] %vm297_vm0, %v717_v47 }
 0x116   : > { %731 = vst.msk [vmem:[#allocation2 + $0x28] sm:$0xff] %vm297_vm0, %v699_v48  ;;  %747 = vst.msk [vmem:[#allocation2 + $0xa8] sm:$0xff] %vm297_vm0, %v715_v49  ;;  %v3145_v50 = vpop.f32.mrb[4].mxu0  ;;  %v3161_v51 = vpop.f32.mrb[4].mxu1 }
 0x117   : > { %v596_v52 = vadd.f32 %v3145_v50, %v3992_v25  ;;  %v660_v53 = vadd.f32 %v3161_v51, %v3992_v25  ;;  %v587_v54 = vpop.f32.mrb[5].mxu0  ;;  %v651_v55 = vpop.f32.mrb[5].mxu1 }
 0x118   : > { %v588_v56 = vadd.f32 %v3992_v25, %v587_v54  ;;  %v652_v57 = vadd.f32 %v3992_v25, %v651_v55  ;;  %v3146_v58 = vpop.f32.mrb[6].mxu0  ;;  %v3162_v59 = vpop.f32.mrb[6].mxu1 }
 0x119   : > { %v704_v60 = vmax.f32 %v596_v52, 0.0  ;;  %v720_v61 = vmax.f32 %v660_v53, 0.0  ;;  %v599_v62 = vadd.f32 %v3146_v58, %v3992_v25  ;;  %v663_v63 = vadd.f32 %v3162_v59, %v3992_v25  ;;  %v590_v0 = vpop.f32.mrb[7].mxu0  ;;  %v654_v1 = vpop.f32.mrb[7].mxu1 }
 0x11a   : > { %v702_v2 = vmax.f32 %v588_v56, 0.0  ;;  %v718_v3 = vmax.f32 %v652_v57, 0.0  ;;  %v591_v4 = vadd.f32 %v3992_v25, %v590_v0  ;;  %v655_v5 = vadd.f32 %v3992_v25, %v654_v1 }
 0x11b   : > { %736 = vst.msk [vmem:[#allocation2 + $0x50] sm:$0xff] %vm297_vm0, %v704_v60  ;;  %752 = vst.msk [vmem:[#allocation2 + $0xd0] sm:$0xff] %vm297_vm0, %v720_v61  ;;  %v705_v6 = vmax.f32 %v599_v62, 0.0  ;;  %v721_v7 = vmax.f32 %v663_v63, 0.0 }
 0x11c   : > { %734 = vst.msk [vmem:[#allocation2 + $0x40] sm:$0xff] %vm297_vm0, %v702_v2  ;;  %750 = vst.msk [vmem:[#allocation2 + $0xc0] sm:$0xff] %vm297_vm0, %v718_v3  ;;  %v703_v8 = vmax.f32 %v591_v4, 0.0  ;;  %v719_v9 = vmax.f32 %v655_v5, 0.0 }
 0x11d   : > { %737 = vst.msk [vmem:[#allocation2 + $0x58] sm:$0xff] %vm297_vm0, %v705_v6  ;;  %753 = vst.msk [vmem:[#allocation2 + $0xd8] sm:$0xff] %vm297_vm0, %v721_v7 }
 0x11e   : > { %735 = vst.msk [vmem:[#allocation2 + $0x48] sm:$0xff] %vm297_vm0, %v703_v8  ;;  %751 = vst.msk [vmem:[#allocation2 + $0xc8] sm:$0xff] %vm297_vm0, %v719_v9  ;;  %v3149_v10 = vpop.f32.mrb[8].mxu0  ;;  %v3165_v11 = vpop.f32.mrb[8].mxu1 }
 0x11f   : > { %v612_v12 = vadd.f32 %v3149_v10, %v3992_v25  ;;  %v676_v13 = vadd.f32 %v3165_v11, %v3992_v25  ;;  %v603_v14 = vpop.f32.mrb[9].mxu0  ;;  %v667_v15 = vpop.f32.mrb[9].mxu1 }
 0x120   : > { %v604_v16 = vadd.f32 %v3992_v25, %v603_v14  ;;  %v668_v17 = vadd.f32 %v3992_v25, %v667_v15  ;;  %v3150_v18 = vpop.f32.mrb[10].mxu0  ;;  %v3166_v19 = vpop.f32.mrb[10].mxu1 }
 0x121   : > { %v708_v20 = vmax.f32 %v612_v12, 0.0  ;;  %v724_v21 = vmax.f32 %v676_v13, 0.0  ;;  %v615_v22 = vadd.f32 %v3150_v18, %v3992_v25  ;;  %v679_v23 = vadd.f32 %v3166_v19, %v3992_v25  ;;  %v606_v24 = vpop.f32.mrb[11].mxu0  ;;  %v670_v26 = vpop.f32.mrb[11].mxu1 }
 0x122   : > { %v706_v27 = vmax.f32 %v604_v16, 0.0  ;;  %v722_v28 = vmax.f32 %v668_v17, 0.0  ;;  %v607_v29 = vadd.f32 %v3992_v25, %v606_v24  ;;  %v671_v30 = vadd.f32 %v3992_v25, %v670_v26 }
 0x123   : > { %740 = vst.msk [vmem:[#allocation2 + $0x70] sm:$0xff] %vm297_vm0, %v708_v20  ;;  %756 = vst.msk [vmem:[#allocation2 + $0xf0] sm:$0xff] %vm297_vm0, %v724_v21  ;;  %v709_v31 = vmax.f32 %v615_v22, 0.0  ;;  %v725_v32 = vmax.f32 %v679_v23, 0.0 }
 0x124   : > { %738 = vst.msk [vmem:[#allocation2 + $0x60] sm:$0xff] %vm297_vm0, %v706_v27  ;;  %754 = vst.msk [vmem:[#allocation2 + $0xe0] sm:$0xff] %vm297_vm0, %v722_v28  ;;  %v707_v33 = vmax.f32 %v607_v29, 0.0  ;;  %v723_v34 = vmax.f32 %v671_v30, 0.0 }
 0x125   : > { %741 = vst.msk [vmem:[#allocation2 + $0x78] sm:$0xff] %vm297_vm0, %v709_v31  ;;  %757 = vst.msk [vmem:[#allocation2 + $0xf8] sm:$0xff] %vm297_vm0, %v725_v32 }
 0x126   : > { %739 = vst.msk [vmem:[#allocation2 + $0x68] sm:$0xff] %vm297_vm0, %v707_v33  ;;  %755 = vst.msk [vmem:[#allocation2 + $0xe8] sm:$0xff] %vm297_vm0, %v723_v34  ;;  %v3153_v35 = vpop.f32.mrb[12].mxu0  ;;  %v3169_v36 = vpop.f32.mrb[12].mxu1 }
 0x127   : > { %v628_v37 = vadd.f32 %v3153_v35, %v3992_v25  ;;  %v692_v38 = vadd.f32 %v3169_v36, %v3992_v25  ;;  %v619_v39 = vpop.f32.mrb[13].mxu0  ;;  %v683_v40 = vpop.f32.mrb[13].mxu1 }
 0x128   : > { %v620_v41 = vadd.f32 %v3992_v25, %v619_v39  ;;  %v684_v42 = vadd.f32 %v3992_v25, %v683_v40  ;;  %v3154_v43 = vpop.f32.mrb[14].mxu0  ;;  %v3170_v44 = vpop.f32.mrb[14].mxu1 }
 0x129   : > { %v712_v45 = vmax.f32 %v628_v37, 0.0  ;;  %v728_v46 = vmax.f32 %v692_v38, 0.0  ;;  %v631_v47 = vadd.f32 %v3154_v43, %v3992_v25  ;;  %v695_v48 = vadd.f32 %v3170_v44, %v3992_v25  ;;  %v622_v49 = vpop.f32.mrb[15].mxu0  ;;  %v686_v50 = vpop.f32.mrb[15].mxu1 }
 0x12a   : > { %v710_v51 = vmax.f32 %v620_v41, 0.0  ;;  %v726_v52 = vmax.f32 %v684_v42, 0.0  ;;  %v623_v53 = vadd.f32 %v3992_v25, %v622_v49  ;;  %v687_v54 = vadd.f32 %v3992_v25, %v686_v50 }
 0x12b   : > { %744 = vst.msk [vmem:[#allocation2 + $0x90] sm:$0xff] %vm297_vm0, %v712_v45  ;;  %760 = vst.msk [vmem:[#allocation2 + $0x110] sm:$0xff] %vm297_vm0, %v728_v46  ;;  %v713_v55 = vmax.f32 %v631_v47, 0.0  ;;  %v729_v56 = vmax.f32 %v695_v48, 0.0 }
 0x12c   : > { %742 = vst.msk [vmem:[#allocation2 + $0x80] sm:$0xff] %vm297_vm0, %v710_v51  ;;  %758 = vst.msk [vmem:[#allocation2 + $0x100] sm:$0xff] %vm297_vm0, %v726_v52  ;;  %v711_v57 = vmax.f32 %v623_v53, 0.0  ;;  %v727_v58 = vmax.f32 %v687_v54, 0.0 }
 0x12d   : > { %745 = vst.msk [vmem:[#allocation2 + $0x98] sm:$0xff] %vm297_vm0, %v713_v55  ;;  %761 = vst.msk [vmem:[#allocation2 + $0x118] sm:$0xff] %vm297_vm0, %v729_v56 }
 0x12e   : > { %743 = vst.msk [vmem:[#allocation2 + $0x88] sm:$0xff] %vm297_vm0, %v711_v57  ;;  %759 = vst.msk [vmem:[#allocation2 + $0x108] sm:$0xff] %vm297_vm0, %v727_v58 }
 0x12f PF: > { %s2983_s10 = sshll.u32 %s3761_s27, 7  ;;  %v763_v25 = vlaneseq  ;;  %v3663_v59 = vld [vmem:[%s4849_s2] sm:$0xff]   ;;  %v3664_v60 = vld [vmem:[%s4849_s2 + $0x8] sm:$0xff]   ;;  %s3780_s22 = smov 32   ;;  %v3665_v48 = vld [vmem:[%s4849_s2 + $0x10] sm:$0xff]   ;;  %vm1219_vm11 = vcmask 261120  }
 0x130   : > { %s4065_s21 = scalar_lea.vmem [#allocation2], %s2983_s10  ;;  %3199 = vmatprep.subr.bf16.mxu0 %v3663_v59  ;;  %s3781_s23 = smov 64   ;;  %v3666_v57 = vld [vmem:[%s4849_s2 + $0x18] sm:$0xff]   ;;  %vm1236_vm12 = vcmask 523264   ;;  %vm1577_vm13 = vcmask 785408  }
 0x131   : > { %v4070_v0 = vshrl.u32 %v763_v25, 7  ;;  %3200 = vmatpush3.bf16.msra.mxu0 %v3663_v59  ;;  %s2949_s17 = sshll.u32 %s3761_s27, 6  ;;  %s2928_s18 = sshll.u32 %s3765_s28, 5 }
 0x132   : > { %3201 = vmatprep.subr.bf16.mxu0 %v3664_v60  ;;  %s2588_s28 = sshll.u32 %s3906_s13, 4  ;;  %s4788_s28 = int_to_ptr.vmem [resolvable:$true] %s2588_s28 }
 0x133   : > { %v765_v6 = vadd.s32 8, %v4070_v0  ;;  %v767_v7 = vadd.s32 24, %v4070_v0  ;;  %v769_v10 = vadd.s32 40, %v4070_v0  ;;  %v771_v11 = vadd.s32 56, %v4070_v0 }
 0x134   : > { %v773_v21 = vadd.s32 72, %v4070_v0  ;;  %v775_v35 = vadd.s32 88, %v4070_v0  ;;  %v777_v46 = vadd.s32 104, %v4070_v0  ;;  %v779_v56 = vadd.s32 120, %v4070_v0 }
 0x135   : > { %v2733_v61 = vld [vmem:[%s4065_s21 + $0x10] sm:$0xff]  ;;  %v2734_v62 = vld [vmem:[%s4065_s21 + $0x18] sm:$0xff]  ;;  %v2739_v63 = vld [vmem:[%s4065_s21 + $0x40] sm:$0xff]  ;;  %v791_v12 = vand.u32 15, %v765_v6  ;;  %v805_v15 = vand.u32 15, %v767_v7  ;;  %v819_v18 = vand.u32 15, %v769_v10  ;;  %3202 = vmatpush3.bf16.msra.mxu0 %v3664_v60 }
 0x136   : > { %v3423_v1 = vpack.i.bf16 %v2734_v62, %v2733_v61  ;;  %v2740_v2 = vld [vmem:[%s4065_s21 + $0x48] sm:$0xff]  ;;  %v2735_v3 = vld [vmem:[%s4065_s21 + $0x20] sm:$0xff]  ;;  %v2737_v13 = vld [vmem:[%s4065_s21 + $0x30] sm:$0xff]  ;;  %v833_v20 = vand.u32 15, %v771_v11  ;;  %v847_v36 = vand.u32 15, %v773_v21  ;;  %v861_v43 = vand.u32 15, %v775_v35  ;;  %3203 = vmatprep.subr.bf16.mxu0 %v3665_v48 }
 0x137   : > { %v2736_v4 = vld [vmem:[%s4065_s21 + $0x28] sm:$0xff]  ;;  %v4075_v5 = vpack.i.bf16 %v2740_v2, %v2739_v63  ;;  %v2752_v9 = vld [vmem:[%s4065_s21 + $0x19] sm:$0xff]  ;;  %v2751_v17 = vld [vmem:[%s4065_s21 + $0x11] sm:$0xff]  ;;  %vm4097_vm1 = vcmp.eq.s32.totalorder %v791_v12, 15  ;;  %vm4101_vm2 = vcmp.eq.s32.totalorder %v805_v15, 15  ;;  %vm4117_vm3 = vcmp.eq.s32.totalorder %v819_v18, 15 }
 0x138   : > { %3424 = vrot.lane.b32.xlu0 %v3423_v1, %s3780_s22  ;;  %v4080_v8 = vpack.i.bf16 %v2736_v4, %v2735_v3  ;;  %v2738_v14 = vld [vmem:[%s4065_s21 + $0x38] sm:$0xff]  ;;  %v4090_v16 = vld [vmem:[%s4065_s21 + $0x29] sm:$0xff]  ;;  %v1076_v24 = vsel %vm4097_vm1, 0.0, %v2752_v9  ;;  %v4112_v27 = vld [vmem:[%s4065_s21 + $0x21] sm:$0xff]  ;;  %vm4130_vm4 = vcmp.eq.s32.totalorder %v833_v20, 15  ;;  %vm4151_vm5 = vcmp.eq.s32.totalorder %v847_v36, 15 }
 0x139   : > { %3439 = vrot.lane.b32.xlu1 %v4075_v5, %s3780_s22  ;;  %v4094_v19 = vld [vmem:[%s4065_s21 + $0x39] sm:$0xff]  ;;  %v4109_v26 = vpack.i.bf16 %v2738_v14, %v2737_v13  ;;  %v1078_v28 = vsel %vm4101_vm2, 0.0, %v4090_v16  ;;  %v3443_v30 = vpack.i.bf16 %v1076_v24, %v2751_v17  ;;  %v4122_v31 = vld [vmem:[%s4065_s21 + $0x31] sm:$0xff]  ;;  %v4128_v33 = vld [vmem:[%s4065_s21 + $0x49] sm:$0xff]  ;;  %vm4175_vm6 = vcmp.eq.s32.totalorder %v861_v43, 15  ;;  %3204 = vmatpush3.bf16.msra.mxu0 %v3665_v48 }
 0x13a   : > { %v1080_v32 = vsel %vm4117_vm3, 0.0, %v4094_v19  ;;  %v3448_v37 = vpack.i.bf16 %v1078_v28, %v4112_v27  ;;  %v4141_v39 = vld [vmem:[%s4065_s21 + $0x41] sm:$0xff]  ;;  %v1082_v40 = vsel %vm4130_vm4, 0.0, %v4128_v33  ;;  %v2741_v41 = vld [vmem:[%s4065_s21 + $0x50] sm:$0xff]  ;;  %v2742_v42 = vld [vmem:[%s4065_s21 + $0x58] sm:$0xff]  ;;  %v875_v58 = vand.u32 15, %v777_v46  ;;  %3205 = vmatprep.subr.bf16.mxu0 %v3666_v57 }
 0x13b   : > { %v3453_v38 = vpack.i.bf16 %v1080_v32, %v4122_v31  ;;  %v4149_v44 = vld [vmem:[%s4065_s21 + $0x59] sm:$0xff]  ;;  %v3458_v47 = vpack.i.bf16 %v1082_v40, %v4141_v39  ;;  %v4162_v49 = vpack.i.bf16 %v2742_v42, %v2741_v41  ;;  %v2744_v51 = vld [vmem:[%s4065_s21 + $0x68] sm:$0xff]  ;;  %v4167_v52 = vld [vmem:[%s4065_s21 + $0x51] sm:$0xff]  ;;  %v889_v2 = vand.u32 15, %v779_v56 }
 0x13c   : > { %3429 = vrot.lane.b32.xlu0 %v4080_v8, %s3780_s22  ;;  %v2743_v50 = vld [vmem:[%s4065_s21 + $0x60] sm:$0xff]  ;;  %v1084_v53 = vsel %vm4151_vm5, 0.0, %v4149_v44  ;;  %v4173_v54 = vld [vmem:[%s4065_s21 + $0x69] sm:$0xff]  ;;  %v2746_v1 = vld [vmem:[%s4065_s21 + $0x78] sm:$0xff]  ;;  %vm4203_vm7 = vcmp.eq.s32.totalorder %v875_v58, 15  ;;  %v1932_v42 = vsel %vm4117_vm3, 0.0, %v4149_v44 }
 0x13d   : > { %3444 = vrot.lane.b32.xlu1 %v3443_v30, %s3781_s23  ;;  %v4184_v25 = vpack.i.bf16 %v2744_v51, %v2743_v50  ;;  %v4187_v59 = vld [vmem:[%s4065_s21 + $0x61] sm:$0xff]  ;;  %v3473_v60 = vpack.i.bf16 %v1084_v53, %v4167_v52  ;;  %v1086_v61 = vsel %vm4175_vm6, 0.0, %v4173_v54  ;;  %v2745_v63 = vld [vmem:[%s4065_s21 + $0x70] sm:$0xff]  ;;  %v4201_v3 = vld [vmem:[%s4065_s21 + $0x79] sm:$0xff]  ;;  %3206 = vmatpush3.bf16.msra.mxu0 %v3666_v57  ;;  %vm4230_vm8 = vcmp.eq.s32.totalorder %v889_v2, 15 }
 0x13e   : > { %v3667_v62 = vld [vmem:[%s4849_s2 + $0x20] sm:$0xff]   ;;  %v3478_v6 = vpack.i.bf16 %v1086_v61, %v4187_v59  ;;  %v3668_v7 = vld [vmem:[%s4849_s2 + $0x28] sm:$0xff]   ;;  %v4214_v9 = vpack.i.bf16 %v2746_v1, %v2745_v63  ;;  %v3669_v12 = vld [vmem:[%s4849_s2 + $0x30] sm:$0xff]   ;;  %v1088_v14 = vsel %vm4203_vm7, 0.0, %v4201_v3  ;;  %v1934_v43 = vsel %vm4130_vm4, 0.0, %v4173_v54 }
 0x13f   : > { %3207 = vmatprep.subr.bf16.mxu0 %v3667_v62  ;;  %v2747_v10 = vld [vmem:[%s4065_s21 + $0x80] sm:$0xff]  ;;  %v2748_v11 = vld [vmem:[%s4065_s21 + $0x88] sm:$0xff]  ;;  %v4222_v13 = vld [vmem:[%s4065_s21 + $0x71] sm:$0xff]  ;;  %3171 = vmatprep.subr.bf16.mxu1 %v3669_v12  ;;  %v3578_v29 = vpack.i.bf16 %v1934_v43, %v4187_v59  ;;  %v1936_v46 = vsel %vm4151_vm5, 0.0, %v4201_v3  ;;  %v768_v4 = vadd.s32 32, %v4070_v0 }
 0x140   : > { %3434 = vrot.lane.b32.xlu0 %v4109_v26, %s3780_s22  ;;  %v4228_v15 = vld [vmem:[%s4065_s21 + $0x89] sm:$0xff]  ;;  %v4235_v18 = vpack.i.bf16 %v2748_v11, %v2747_v10  ;;  %v3493_v20 = vpack.i.bf16 %v1088_v14, %v4222_v13  ;;  %v4241_v21 = vld [vmem:[%s4065_s21 + $0x81] sm:$0xff]  ;;  %3172 = vmatpush3.bf16.msra.mxu1 %v3669_v12  ;;  %v3671_v32 = vld [vmem:[%s4849_s2 + $0x38] sm:$0xff]   ;;  %v3608_v48 = vpack.i.bf16 %v1936_v46, %v4222_v13 }
 0x141   : > { %3449 = vrot.lane.b32.xlu1 %v3448_v37, %s3781_s23  ;;  %3208 = vmatpush3.bf16.msra.mxu0 %v3667_v62  ;;  %v1090_v24 = vsel %vm4230_vm8, 0.0, %v4228_v15  ;;  %v4249_v28 = vld [vmem:[%s4849_s2 + $0x60] sm:$0xff]   ;;  %v3675_v36 = vld [vmem:[%s4849_s2 + $0x48] sm:$0xff]   ;;  %v1345_v37 = vsel %vm4097_vm1, 0.0, %v4090_v16  ;;  %v3677_v40 = vld [vmem:[%s4849_s2 + $0x50] sm:$0xff]   ;;  %v1347_v16 = vsel %vm4101_vm2, 0.0, %v4094_v19 }
 0x142   : > { %3209 = vmatprep.subr.bf16.mxu0 %v3668_v7  ;;  %v3498_v30 = vpack.i.bf16 %v1090_v24, %v4241_v21  ;;  %3173 = vmatprep.subr.bf16.mxu1 %v3671_v32  ;;  %v3673_v35 = vld [vmem:[%s4849_s2 + $0x40] sm:$0xff]   ;;  %v3679_v41 = vld [vmem:[%s4849_s2 + $0x58] sm:$0xff]   ;;  %v3533_v22 = vpack.i.bf16 %v1347_v16, %v4122_v31  ;;  %v1938_v45 = vsel %vm4175_vm6, 0.0, %v4228_v15  ;;  %v2863_v51 = vld [vmem:[%s4065_s21 + $0x90] sm:$0xff]  ;;  %v812_v11 = vand.u32 15, %v768_v4 }
 0x143   : > { %v3618_v50 = vpack.i.bf16 %v1938_v45, %v4241_v21  ;;  %v2865_v55 = vld [vmem:[%s4065_s21 + $0xa0] sm:$0xff]  ;;  %v2866_v56 = vld [vmem:[%s4065_s21 + $0xa8] sm:$0xff] }
 0x144   : > { %3454 = vrot.lane.b32.xlu0 %v3453_v38, %s3781_s23  ;;  %3174 = vmatpush3.bf16.msra.mxu1 %v3671_v32  ;;  %v3518_v38 = vpack.i.bf16 %v1345_v37, %v4112_v27  ;;  %v2882_v57 = vld [vmem:[%s4065_s21 + $0x99] sm:$0xff]  ;;  %v2884_v62 = vld [vmem:[%s4065_s21 + $0xa9] sm:$0xff]  ;;  %v2883_v2 = vld [vmem:[%s4065_s21 + $0xa1] sm:$0xff]  ;;  %vm4397_vm10 = vcmp.eq.s32.totalorder %v812_v11, 0 }
 0x145   : > { %3459 = vrot.lane.b32.xlu1 %v3458_v47, %s3781_s23  ;;  %3210 = vmatpush3.bf16.msra.mxu0 %v3668_v7  ;;  %v1355_v47 = vsel %vm4175_vm6, 0.0, %v4201_v3  ;;  %v1359_v61 = vsel %vm4230_vm8, 0.0, %v2882_v57  ;;  %v1942_v3 = vsel %vm4230_vm8, 0.0, %v2884_v62  ;;  %v784_v7 = vand.u32 15, %v4070_v0  ;;  %v4395_v24 = vld [vmem:[%s4065_s21 + $0x2f] sm:$0xff]  ;;  %v2987_v32 = vld [vmem:[%s4065_s21 + $0x17] sm:$0xff] }
 0x146   : > { %3227 = vmatprep.subr.bf16.mxu0 %v4249_v28  ;;  %3175 = vmatprep.subr.bf16.mxu1 %v3673_v35  ;;  %v1047_v16 = vsel %vm4397_vm10, 0.0, %v4395_v24  ;;  %v4422_v43 = vld [vmem:[%s4065_s21 + $0x27] sm:$0xff] }
 0x147   : > { %vm4389_vm9 = vcmp.eq.s32.totalorder %v784_v7, 0 }
 0x148   : > { %3464 = vrot.lane.b32.xlu0 %v4162_v49, %s3780_s22  ;;  %3176 = vmatpush3.bf16.msra.mxu1 %v3673_v35 }
 0x149   : > { %3469 = vrot.lane.b32.xlu1 %v4184_v25, %s3780_s22  ;;  %3177 = vmatprep.subr.bf16.mxu1 %v3675_v36 }
 0x14c   : > { %3474 = vrot.lane.b32.xlu0 %v3473_v60, %s3781_s23  ;;  %3178 = vmatpush3.bf16.msra.mxu1 %v3675_v36  ;;  %v1940_v60 = vsel %vm4203_vm7, 0.0, %v2882_v57  ;;  %v772_v36 = vadd.s32 64, %v4070_v0 }
 0x14d   : > { %3479 = vrot.lane.b32.xlu1 %v3478_v6, %s3781_s23  ;;  %3179 = vmatprep.subr.bf16.mxu1 %v3677_v40  ;;  %v3658_v6 = vpack.i.bf16 %v1942_v3, %v2883_v2 }
 0x14e   : > { %v840_v46 = vand.u32 15, %v772_v36 }
 0x150   : > { %3484 = vrot.lane.b32.xlu0 %v4214_v9, %s3780_s22  ;;  %3180 = vmatpush3.bf16.msra.mxu1 %v3677_v40  ;;  %vm4450_vm0 = vcmp.eq.s32.totalorder %v840_v46, 0 }
 0x151   : > { %3489 = vrot.lane.b32.xlu1 %v4235_v18, %s3780_s22  ;;  %3181 = vmatprep.subr.bf16.mxu1 %v3679_v41 }
 0x154   : > { %3494 = vrot.lane.b32.xlu0 %v3493_v20, %s3781_s23  ;;  %3182 = vmatpush3.bf16.msra.mxu1 %v3679_v41 }
 0x155   : > { %3499 = vrot.lane.b32.xlu1 %v3498_v30, %s3781_s23 }
 0x158   : > { %3504 = vrot.lane.b32.xlu0 %v4080_v8, %s3780_s22  ;;  %v1928_v8 = vsel %vm4097_vm1, 0.0, %v4094_v19 }
 0x159   : > { %3509 = vrot.lane.b32.xlu1 %v4109_v26, %s3780_s22  ;;  %v3528_v27 = vpack.i.bf16 %v1928_v8, %v4122_v31  ;;  %v1349_v31 = vsel %vm4117_vm3, 0.0, %v4128_v33 }
 0x15a   : > { %v3558_v23 = vpack.i.bf16 %v1349_v31, %v4141_v39 }
 0x15c   : > { %3514 = vrot.lane.b32.xlu0 %v4109_v26, %s3780_s22  ;;  %v1930_v26 = vsel %vm4101_vm2, 0.0, %v4128_v33  ;;  %v3568_v33 = vpack.i.bf16 %v1932_v42, %v4167_v52 }
 0x15d   : > { %3519 = vrot.lane.b32.xlu1 %v3518_v38, %s3781_s23  ;;  %v3538_v19 = vpack.i.bf16 %v1930_v26, %v4141_v39  ;;  %v4406_v38 = vld [vmem:[%s4065_s21 + $0x1f] sm:$0xff] }
 0x160   : > { %3524 = vrot.lane.b32.xlu0 %v4075_v5, %s3780_s22 }
 0x161   : > { %3529 = vrot.lane.b32.xlu1 %v3528_v27, %s3781_s23  ;;  %v774_v27 = vadd.s32 80, %v4070_v0 }
 0x163   : > { %v854_v45 = vand.u32 15, %v774_v27  ;;  %v3674_v27 = vld [vmem:[%s4849_s2 + $0x70] sm:$0xff]  }
 0x164   : > { %3534 = vrot.lane.b32.xlu0 %v3533_v22, %s3781_s23 }
 0x165   : > { %3539 = vrot.lane.b32.xlu1 %v3538_v19, %s3781_s23  ;;  %vm4478_vm1 = vcmp.eq.s32.totalorder %v854_v45, 0 }
 0x168   : > { %3544 = vrot.lane.b32.xlu0 %v4075_v5, %s3780_s22  ;;  %v1351_v5 = vsel %vm4130_vm4, 0.0, %v4149_v44  ;;  %v1353_v44 = vsel %vm4151_vm5, 0.0, %v4173_v54  ;;  %v1357_v54 = vsel %vm4203_vm7, 0.0, %v4228_v15  ;;  %v770_v15 = vadd.s32 48, %v4070_v0 }
 0x169   : > { %3549 = vrot.lane.b32.xlu1 %v4162_v49, %s3780_s22  ;;  %v3573_v39 = vpack.i.bf16 %v1351_v5, %v4167_v52  ;;  %v3598_v34 = vpack.i.bf16 %v1353_v44, %v4187_v59  ;;  %v2864_v52 = vld [vmem:[%s4065_s21 + $0x98] sm:$0xff]  ;;  %v3638_v58 = vpack.i.bf16 %v1357_v54, %v4241_v21 }
 0x16a   : > { %v3628_v53 = vpack.i.bf16 %v2864_v52, %v2863_v51  ;;  %v2881_v59 = vld [vmem:[%s4065_s21 + $0x91] sm:$0xff]  ;;  %v826_v37 = vand.u32 15, %v770_v15 }
 0x16b   : > { %v3648_v63 = vpack.i.bf16 %v1940_v60, %v2881_v59  ;;  %v3653_v1 = vpack.i.bf16 %v1359_v61, %v2881_v59 }
 0x16c   : > { %3554 = vrot.lane.b32.xlu0 %v4162_v49, %s3780_s22  ;;  %v3613_v49 = vpack.i.bf16 %v1355_v47, %v4222_v13  ;;  %v2986_v13 = vld [vmem:[%s4065_s21 + $0xf] sm:$0xff]  ;;  %vm4429_vm15 = vcmp.eq.s32.totalorder %v826_v37, 0 }
 0x16d   : > { %3559 = vrot.lane.b32.xlu1 %v3558_v23, %s3781_s23  ;;  %v1043_v35 = vsel %vm4389_vm9, 0.0, %v2986_v13 }
 0x170   : > { %3564 = vrot.lane.b32.xlu0 %v4184_v25, %s3780_s22 }
 0x171   : > { %3569 = vrot.lane.b32.xlu1 %v3568_v33, %s3781_s23 }
 0x174   : > { %3574 = vrot.lane.b32.xlu0 %v3573_v39, %s3781_s23  ;;  %v4419_v39 = vld [vmem:[%s4065_s21 + $0x37] sm:$0xff] }
 0x175   : > { %3579 = vrot.lane.b32.xlu1 %v3578_v29, %s3781_s23 }
 0x178   : > { %3584 = vrot.lane.b32.xlu0 %v4184_v25, %s3780_s22  ;;  %v3643_v25 = vpack.i.bf16 %v2866_v56, %v2865_v55  ;;  %v4438_v56 = vld [vmem:[%s4065_s21 + $0x3f] sm:$0xff] }
 0x179   : > { %3589 = vrot.lane.b32.xlu1 %v4214_v9, %s3780_s22  ;;  %v1049_v11 = vsel %vm4429_vm15, 0.0, %v4438_v56 }
 0x17c   : > { %3594 = vrot.lane.b32.xlu0 %v4214_v9, %s3780_s22  ;;  %v766_v9 = vadd.s32 16, %v4070_v0 }
 0x17d   : > { %3599 = vrot.lane.b32.xlu1 %v3598_v34, %s3781_s23 }
 0x17e   : > { %v798_v17 = vand.u32 15, %v766_v9  ;;  %v3672_v9 = vld [vmem:[%s4849_s2 + $0x68] sm:$0xff]  }
 0x180   : > { %3604 = vrot.lane.b32.xlu0 %v4235_v18, %s3780_s22  ;;  %vm4408_vm14 = vcmp.eq.s32.totalorder %v798_v17, 0 }
 0x181   : > { %3609 = vrot.lane.b32.xlu1 %v3608_v48, %s3781_s23  ;;  %v1045_v29 = vsel %vm4408_vm14, 0.0, %v4406_v38  ;;  %v1913_v14 = vsel %vm4408_vm14, 0.0, %v4438_v56 }
 0x184   : > { %3614 = vrot.lane.b32.xlu0 %v3613_v49, %s3781_s23 }
 0x185   : > { %3619 = vrot.lane.b32.xlu1 %v3618_v50, %s3781_s23  ;;  %v776_v50 = vadd.s32 96, %v4070_v0 }
 0x188   : > { %3624 = vrot.lane.b32.xlu0 %v4235_v18, %s3780_s22 }
 0x189   : > { %3629 = vrot.lane.b32.xlu1 %v3628_v53, %s3780_s22 }
 0x18c   : > { %3634 = vrot.lane.b32.xlu0 %v3628_v53, %s3780_s22 }
 0x18d   : > { %3639 = vrot.lane.b32.xlu1 %v3638_v58, %s3781_s23 }
 0x190   : > { %3644 = vrot.lane.b32.xlu0 %v3643_v25, %s3780_s22  ;;  %s4736_s22 = scalar_lea.vmem %s3904_s12, %s2949_s17  ;;  %s2950_s12 = sshll.u32 %s3761_s27, 4 }
 0x191   : > { %3649 = vrot.lane.b32.xlu1 %v3648_v63, %s3781_s23  ;;  %v4448_v63 = vld [vmem:[%s4065_s21 + $0x4f] sm:$0xff]  ;;  %s2585_s11 = sadd.s32 %s2950_s12, %s2928_s18  ;;  %s4795_s17 = scalar_lea.sflag [#allocation4], %s283_s20 }
 0x192   : > { %s2929_s27 = sshll.u32 %s2585_s11, 7 }
 0x193   : > { %s4786_s16 = scalar_lea.hbm %s4854_s7, %s2929_s27 }
 0x194   : > { %3654 = vrot.lane.b32.xlu0 %v3653_v1, %s3781_s23 }
 0x195   : > { %3659 = vrot.lane.b32.xlu1 %v3658_v6, %s3781_s23  ;;  %s3782_s23 = smov [#allocation3]  }
 0x1aa   : > { %v3425_v10 = vpop.permute.xlu0 %3424 }
 0x1ab   : > { %v4386_v12 = vpop.permute.xlu1 %3439  ;;  %v3427_v18 = vunpack.i.h.bf16 %v3425_v10  ;;  %v3426_v20 = vunpack.i.l.bf16 %v3425_v10  ;;  %v4461_v10 = vld [vmem:[%s4065_s21 + $0x47] sm:$0xff] }
 0x1ac   : > { %v3442_v60 = vunpack.i.h.bf16 %v4386_v12  ;;  %v3441_v2 = vunpack.i.l.bf16 %v4386_v12 }
 0x1ad   : > { %v1220_v19 = vsel %vm1219_vm11, %v1043_v35, %v3426_v20  ;;  %v1221_v31 = vsel %vm1219_vm11, %v2987_v32, %v3427_v18  ;;  %v4467_v18 = vld [vmem:[%s4065_s21 + $0x57] sm:$0xff]  ;;  %v1051_v20 = vsel %vm4450_vm0, 0.0, %v4448_v63  ;;  %v868_v35 = vand.u32 15, %v776_v50 }
 0x1ae   : > { %v3430_v21 = vpop.permute.xlu0 %3429  ;;  %v1226_v36 = vsel %vm1219_vm11, %v1049_v11, %v3441_v2  ;;  %v1227_v37 = vsel %vm1219_vm11, %v4461_v10, %v3442_v60 }
 0x1af   : > { %v3445_v8 = vpop.permute.xlu1 %3444  ;;  %v3432_v23 = vunpack.i.h.bf16 %v3430_v21  ;;  %v3431_v42 = vunpack.i.l.bf16 %v3430_v21  ;;  %vm4497_vm2 = vcmp.eq.s32.totalorder %v868_v35, 0 }
 0x1b0   : > { %v3447_v41 = vunpack.i.h.bf16 %v3445_v8  ;;  %v3446_v22 = vunpack.i.l.bf16 %v3445_v8 }
 0x1b1   : > { %v1222_v57 = vsel %vm1219_vm11, %v1045_v29, %v3431_v42  ;;  %v1223_v58 = vsel %vm1219_vm11, %v4422_v43, %v3432_v23 }
 0x1b2   : > { %v3435_v26 = vpop.permute.xlu0 %3434  ;;  %v1237_v44 = vsel %vm1236_vm12, %v1220_v19, %v3446_v22  ;;  %v1238_v34 = vsel %vm1236_vm12, %v1221_v31, %v3447_v41  ;;  %v4491_v19 = vld [vmem:[%s4065_s21 + $0x5f] sm:$0xff] }
 0x1b3   : > { %v3437_v5 = vunpack.i.h.bf16 %v3435_v26  ;;  %v3436_v33 = vunpack.i.l.bf16 %v3435_v26  ;;  %v3450_v48 = vpop.permute.xlu1 %3449  ;;  %v1253_v49 = vpack.c.bf16 %v1238_v34, %v1237_v44  ;;  %v4495_v44 = vld [vmem:[%s4065_s21 + $0x6f] sm:$0xff] }
 0x1b4   : > { %v3452_v53 = vunpack.i.h.bf16 %v3450_v48  ;;  %v3451_v54 = vunpack.i.l.bf16 %v3450_v48  ;;  %v4502_v48 = vld [vmem:[%s4065_s21 + $0x67] sm:$0xff] }
 0x1b5   : > { %v1224_v51 = vsel %vm1219_vm11, %v1047_v16, %v3436_v33  ;;  %v1225_v52 = vsel %vm1219_vm11, %v4419_v39, %v3437_v5  ;;  %3211 = vmatprep.mubr.msk.bf16.mxu0 %vm1577_vm13, %v1253_v49  ;;  %v778_v5 = vadd.s32 112, %v4070_v0  ;;  %v1053_v49 = vsel %vm4478_vm1, 0.0, %v4491_v19 }
 0x1b6   : > { %v3455_v55 = vpop.permute.xlu0 %3454  ;;  %v1240_v61 = vsel %vm1236_vm12, %v1223_v58, %v3452_v53  ;;  %v1239_v62 = vsel %vm1236_vm12, %v1222_v57, %v3451_v54  ;;  %v4513_v57 = vld [vmem:[%s4065_s21 + $0x77] sm:$0xff]  ;;  %v1055_v58 = vsel %vm4497_vm2, 0.0, %v4495_v44 }
 0x1b7   : > { %v3457_v25 = vunpack.i.h.bf16 %v3455_v55  ;;  %v3456_v59 = vunpack.i.l.bf16 %v3455_v55  ;;  %v1254_v3 = vpack.c.bf16 %v1240_v61, %v1239_v62  ;;  %v3460_v7 = vpop.permute.xlu1 %3459  ;;  %v882_v60 = vand.u32 15, %v778_v5 }
 0x1b8   : > { %v3462_v15 = vunpack.i.h.bf16 %v3460_v7  ;;  %v3461_v17 = vunpack.i.l.bf16 %v3460_v7 }
 0x1b9   : > { %v1242_v6 = vsel %vm1236_vm12, %v1225_v52, %v3457_v25  ;;  %v1241_v4 = vsel %vm1236_vm12, %v1224_v51, %v3456_v59  ;;  %3212 = vmatmul.mubr.msk.bf16.vlgmr.msra.gmra.mrb[0].mxu0 %vm1577_vm13, %v1254_v3  ;;  %v3676_v51 = vld [vmem:[%s4849_s2 + $0x78] sm:$0xff]   ;;  %vm4534_vm3 = vcmp.eq.s32.totalorder %v882_v60, 0 }
 0x1ba   : > { %v1255_v13 = vpack.c.bf16 %v1242_v6, %v1241_v4  ;;  %v3465_v12 = vpop.permute.xlu0 %3464  ;;  %3228 = vmatpush3.bf16.msra.mxu0 %v4249_v28  ;;  %v1244_v41 = vsel %vm1236_vm12, %v1227_v37, %v3462_v15  ;;  %v1243_v28 = vsel %vm1236_vm12, %v1226_v36, %v3461_v17  ;;  %v3678_v4 = vld [vmem:[%s4849_s2 + $0x80] sm:$0xff]  }
 0x1bb   : > { %v3467_v21 = vunpack.i.h.bf16 %v3465_v12  ;;  %v3466_v32 = vunpack.i.l.bf16 %v3465_v12  ;;  %v3470_v16 = vpop.permute.xlu1 %3469  ;;  %3229 = vmatprep.subr.bf16.mxu0 %v3672_v9  ;;  %v1256_v46 = vpack.c.bf16 %v1244_v41, %v1243_v28  ;;  %v3039_v15 = vld [vmem:[%s4065_s21 + $0xa7] sm:$0xff] }
 0x1bc   : > { %3215 = vmatprep.mubr.msk.bf16.mxu0 %vm1577_vm13, %v1255_v13  ;;  %v3472_v33 = vunpack.i.h.bf16 %v3470_v16  ;;  %v3471_v29 = vunpack.i.l.bf16 %v3470_v16  ;;  %v4532_v13 = vld [vmem:[%s4065_s21 + $0x7f] sm:$0xff]  ;;  %v3680_v16 = vld [vmem:[%s4849_s2 + $0x88] sm:$0xff]  }
 0x1bd   : > { %v1229_v22 = vsel %vm1219_vm11, %v4467_v18, %v3467_v21  ;;  %v1228_v26 = vsel %vm1219_vm11, %v1051_v20, %v3466_v32  ;;  %v1057_v41 = vsel %vm4534_vm3, 0.0, %v4532_v13 }
 0x1be   : > { %v3475_v31 = vpop.permute.xlu0 %3474  ;;  %3230 = vmatpush3.bf16.msra.mxu0 %v3672_v9  ;;  %v1231_v61 = vsel %vm1219_vm11, %v4502_v48, %v3472_v33  ;;  %v1230_v62 = vsel %vm1219_vm11, %v1053_v49, %v3471_v29 }
 0x1bf   : > { %v3477_v23 = vunpack.i.h.bf16 %v3475_v31  ;;  %v3476_v42 = vunpack.i.l.bf16 %v3475_v31  ;;  %v3480_v50 = vpop.permute.xlu1 %3479  ;;  %3231 = vmatprep.subr.bf16.mxu0 %v3674_v27 }
 0x1c0   : > { %v3482_v53 = vunpack.i.h.bf16 %v3480_v50  ;;  %v3481_v54 = vunpack.i.l.bf16 %v3480_v50 }
 0x1c1   : > { %v1245_v45 = vsel %vm1236_vm12, %v1228_v26, %v3476_v42  ;;  %v1246_v0 = vsel %vm1236_vm12, %v1229_v22, %v3477_v23  ;;  %3216 = vmatmul.mubr.msk.bf16.gmra.mrb[4].mxu0 %vm1577_vm13, %v1256_v46 }
 0x1c2   : > { %v1257_v52 = vpack.c.bf16 %v1246_v0, %v1245_v45  ;;  %v3485_v55 = vpop.permute.xlu0 %3484  ;;  %3232 = vmatpush3.bf16.msra.mxu0 %v3674_v27  ;;  %v1247_v2 = vsel %vm1236_vm12, %v1230_v62, %v3481_v54  ;;  %v1248_v3 = vsel %vm1236_vm12, %v1231_v61, %v3482_v53  ;;  %v4544_v27 = vld [vmem:[%s4065_s21 + $0x87] sm:$0xff]  ;;  %v1328_v0 = vsel %vm4389_vm9, 0.0, %v4406_v38 }
 0x1c3   : > { %v3487_v25 = vunpack.i.h.bf16 %v3485_v55  ;;  %v3486_v59 = vunpack.i.l.bf16 %v3485_v55  ;;  %v3490_v6 = vpop.permute.xlu1 %3489  ;;  %3233 = vmatprep.subr.bf16.mxu0 %v3676_v51  ;;  %v1258_v20 = vpack.c.bf16 %v1248_v3, %v1247_v2  ;;  %v1330_v3 = vsel %vm4408_vm14, 0.0, %v4395_v24 }
 0x1c4   : > { %3219 = vmatprep.mubr.msk.bf16.mxu0 %vm1577_vm13, %v1257_v52  ;;  %v3492_v21 = vunpack.i.h.bf16 %v3490_v6  ;;  %v3491_v32 = vunpack.i.l.bf16 %v3490_v6 }
 0x1c5   : > { %v1233_v7 = vsel %vm1219_vm11, %v4513_v57, %v3487_v25  ;;  %v1232_v9 = vsel %vm1219_vm11, %v1055_v58, %v3486_v59  ;;  %v1911_v25 = vsel %vm4389_vm9, 0.0, %v4395_v24 }
 0x1c6   : > { %v3495_v11 = vpop.permute.xlu0 %3494  ;;  %3234 = vmatpush3.bf16.msra.mxu0 %v3676_v51  ;;  %v1235_v23 = vsel %vm1219_vm11, %v4544_v27, %v3492_v21  ;;  %v1234_v42 = vsel %vm1219_vm11, %v1057_v41, %v3491_v32 }
 0x1c7   : > { %v3497_v17 = vunpack.i.h.bf16 %v3495_v11  ;;  %v3496_v12 = vunpack.i.l.bf16 %v3495_v11  ;;  %v3500_v37 = vpop.permute.xlu1 %3499  ;;  %3235 = vmatprep.subr.bf16.mxu0 %v3678_v4 }
 0x1c8   : > { %v3502_v22 = vunpack.i.h.bf16 %v3500_v37  ;;  %v3501_v26 = vunpack.i.l.bf16 %v3500_v37 }
 0x1c9   : > { %v1249_v35 = vsel %vm1236_vm12, %v1232_v9, %v3496_v12  ;;  %v1250_v36 = vsel %vm1236_vm12, %v1233_v7, %v3497_v17  ;;  %3220 = vmatmul.mubr.msk.bf16.gmra.mrb[8].mxu0 %vm1577_vm13, %v1258_v20 }
 0x1ca   : > { %v1259_v28 = vpack.c.bf16 %v1250_v36, %v1249_v35  ;;  %v3505_v31 = vpop.permute.xlu0 %3504  ;;  %3236 = vmatpush3.bf16.msra.mxu0 %v3678_v4  ;;  %v1251_v33 = vsel %vm1236_vm12, %v1234_v42, %v3501_v26  ;;  %v1252_v29 = vsel %vm1236_vm12, %v1235_v23, %v3502_v22 }
 0x1cb   : > { %v3510_v5 = vpop.permute.xlu1 %3509  ;;  %3237 = vmatprep.subr.bf16.mxu0 %v3680_v16  ;;  %v3507_v49 = vunpack.i.h.bf16 %v3505_v31  ;;  %v3506_v45 = vunpack.i.l.bf16 %v3505_v31  ;;  %v1260_v50 = vpack.c.bf16 %v1252_v29, %v1251_v33 }
 0x1cc   : > { %3223 = vmatprep.mubr.msk.bf16.mxu0 %vm1577_vm13, %v1259_v28  ;;  %v3512_v52 = vunpack.i.h.bf16 %v3510_v5  ;;  %v3511_v53 = vunpack.i.l.bf16 %v3510_v5 }
 0x1cd   : > { %v1488_v59 = vsel %vm1219_vm11, %v1328_v0, %v3506_v45  ;;  %v1489_v60 = vsel %vm1219_vm11, %v4422_v43, %v3507_v49 }
 0x1ce   : > { %v3515_v46 = vpop.permute.xlu0 %3514  ;;  %3238 = vmatpush3.bf16.msra.mxu0 %v3680_v16  ;;  %v2072_v7 = vsel %vm1219_vm11, %v4419_v39, %v3512_v52  ;;  %v2071_v43 = vsel %vm1219_vm11, %v1911_v25, %v3511_v53 }
 0x1cf   : > { %v3520_v51 = vpop.permute.xlu1 %3519  ;;  %v3517_v38 = vunpack.i.h.bf16 %v3515_v46  ;;  %v3516_v61 = vunpack.i.l.bf16 %v3515_v46 }
 0x1d0   : > { %v3522_v54 = vunpack.i.h.bf16 %v3520_v51  ;;  %v3521_v55 = vunpack.i.l.bf16 %v3520_v51 }
 0x1d1   : > { %3224 = vmatmul.mubr.msk.bf16.gmra.mrb[12].mxu0 %vm1577_vm13, %v1260_v50  ;;  %v1491_v24 = vsel %vm1219_vm11, %v4419_v39, %v3517_v38  ;;  %v1490_v40 = vsel %vm1219_vm11, %v1330_v3, %v3516_v61  ;;  %v1332_v50 = vsel %vm4397_vm10, 0.0, %v4438_v56 }
 0x1d2   : > { %v3525_v58 = vpop.permute.xlu0 %3524  ;;  %v1504_v62 = vsel %vm1236_vm12, %v1488_v59, %v3521_v55  ;;  %v1505_v2 = vsel %vm1236_vm12, %v1489_v60, %v3522_v54  ;;  %v1915_v60 = vsel %vm4397_vm10, 0.0, %v4448_v63 }
 0x1d3   : > { %v3530_v6 = vpop.permute.xlu1 %3529  ;;  %v1520_v4 = vpack.c.bf16 %v1505_v2, %v1504_v62  ;;  %v3527_v12 = vunpack.i.h.bf16 %v3525_v58  ;;  %v3526_v20 = vunpack.i.l.bf16 %v3525_v58  ;;  %v1334_v2 = vsel %vm4429_vm15, 0.0, %v4448_v63 }
 0x1d4   : > { %v3532_v9 = vunpack.i.h.bf16 %v3530_v6  ;;  %v3531_v11 = vunpack.i.l.bf16 %v3530_v6 }
 0x1d5   : > { %3183 = vmatprep.mubr.msk.bf16.mxu1 %vm1577_vm13, %v1520_v4  ;;  %v2074_v42 = vsel %vm1219_vm11, %v4461_v10, %v3527_v12  ;;  %v2073_v39 = vsel %vm1219_vm11, %v1913_v14, %v3526_v20 }
 0x1d6   : > { %v3535_v17 = vpop.permute.xlu0 %3534  ;;  %v2087_v35 = vsel %vm1236_vm12, %v2071_v43, %v3531_v11  ;;  %v2088_v36 = vsel %vm1236_vm12, %v2072_v7, %v3532_v9 }
 0x1d7   : > { %v3537_v21 = vunpack.i.h.bf16 %v3535_v17  ;;  %v3536_v32 = vunpack.i.l.bf16 %v3535_v17  ;;  %v2103_v37 = vpack.c.bf16 %v2088_v36, %v2087_v35  ;;  %v3540_v28 = vpop.permute.xlu1 %3539 }
 0x1d8   : > { %v3542_v26 = vunpack.i.h.bf16 %v3540_v28  ;;  %v3541_v31 = vunpack.i.l.bf16 %v3540_v28 }
 0x1d9   : > { %v1507_v16 = vsel %vm1236_vm12, %v1491_v24, %v3537_v21  ;;  %v1506_v41 = vsel %vm1236_vm12, %v1490_v40, %v3536_v32  ;;  %3239 = vmatprep.mubr.msk.bf16.mxu0 %vm1577_vm13, %v2103_v37 }
 0x1da   : > { %v1521_v22 = vpack.c.bf16 %v1507_v16, %v1506_v41  ;;  %v3545_v23 = vpop.permute.xlu0 %3544  ;;  %v2090_v5 = vsel %vm1236_vm12, %v2074_v42, %v3542_v26  ;;  %v2089_v33 = vsel %vm1236_vm12, %v2073_v39, %v3541_v31 }
 0x1db   : > { %v2104_v29 = vpack.c.bf16 %v2090_v5, %v2089_v33  ;;  %v3550_v46 = vpop.permute.xlu1 %3549  ;;  %v3547_v45 = vunpack.i.h.bf16 %v3545_v23  ;;  %v3546_v0 = vunpack.i.l.bf16 %v3545_v23  ;;  %v1336_v33 = vsel %vm4450_vm0, 0.0, %v4491_v19 }
 0x1dc   : > { %3184 = vmatmul.mubr.msk.bf16.vlgmr.msra.gmra.mrb[0].mxu1 %vm1577_vm13, %v1521_v22  ;;  %v3552_v52 = vunpack.i.h.bf16 %v3550_v46  ;;  %v3551_v53 = vunpack.i.l.bf16 %v3550_v46 }
 0x1dd   : > { %3240 = vmatmul.mubr.msk.bf16.vlgmr.msra.gmra.mrb[0].mxu0 %vm1577_vm13, %v2104_v29  ;;  %v1493_v25 = vsel %vm1219_vm11, %v4461_v10, %v3547_v45  ;;  %v1492_v59 = vsel %vm1219_vm11, %v1332_v50, %v3546_v0  ;;  %v1917_v10 = vsel %vm4429_vm15, 0.0, %v4491_v19 }
 0x1de   : > { %v3555_v49 = vpop.permute.xlu0 %3554  ;;  %v2076_v30 = vsel %vm1219_vm11, %v4467_v18, %v3552_v52  ;;  %v2075_v6 = vsel %vm1219_vm11, %v1915_v60, %v3551_v53  ;;  %v1919_v53 = vsel %vm4450_vm0, 0.0, %v4495_v44 }
 0x1df   : > { %v3560_v51 = vpop.permute.xlu1 %3559  ;;  %v3557_v38 = vunpack.i.h.bf16 %v3555_v49  ;;  %v3556_v61 = vunpack.i.l.bf16 %v3555_v49 }
 0x1e0   : > { %v3562_v54 = vunpack.i.h.bf16 %v3560_v51  ;;  %v3561_v55 = vunpack.i.l.bf16 %v3560_v51 }
 0x1e1   : > { %v1495_v63 = vsel %vm1219_vm11, %v4467_v18, %v3557_v38  ;;  %v1494_v47 = vsel %vm1219_vm11, %v1334_v2, %v3556_v61 }
 0x1e2   : > { %v3565_v58 = vpop.permute.xlu0 %3564  ;;  %v1509_v62 = vsel %vm1236_vm12, %v1493_v25, %v3562_v54  ;;  %v1508_v56 = vsel %vm1236_vm12, %v1492_v59, %v3561_v55  ;;  %v1338_v25 = vsel %vm4478_vm1, 0.0, %v4495_v44 }
 0x1e3   : > { %v1522_v3 = vpack.c.bf16 %v1509_v62, %v1508_v56  ;;  %v3570_v14 = vpop.permute.xlu1 %3569  ;;  %v3567_v9 = vunpack.i.h.bf16 %v3565_v58  ;;  %v3566_v11 = vunpack.i.l.bf16 %v3565_v58 }
 0x1e4   : > { %v3572_v4 = vunpack.i.h.bf16 %v3570_v14  ;;  %v3571_v7 = vunpack.i.l.bf16 %v3570_v14 }
 0x1e5   : > { %3187 = vmatprep.mubr.msk.bf16.mxu1 %vm1577_vm13, %v1522_v3  ;;  %v2078_v28 = vsel %vm1219_vm11, %v4502_v48, %v3567_v9  ;;  %v2077_v18 = vsel %vm1219_vm11, %v1917_v10, %v3566_v11 }
 0x1e6   : > { %v3575_v43 = vpop.permute.xlu0 %3574  ;;  %v2091_v20 = vsel %vm1236_vm12, %v2075_v6, %v3571_v7  ;;  %v2092_v21 = vsel %vm1236_vm12, %v2076_v30, %v3572_v4 }
 0x1e7   : > { %v3577_v17 = vunpack.i.h.bf16 %v3575_v43  ;;  %v3576_v12 = vunpack.i.l.bf16 %v3575_v43  ;;  %v2105_v32 = vpack.c.bf16 %v2092_v21, %v2091_v20  ;;  %v3580_v35 = vpop.permute.xlu1 %3579 }
 0x1e8   : > { %v3582_v37 = vunpack.i.h.bf16 %v3580_v35  ;;  %v3581_v16 = vunpack.i.l.bf16 %v3580_v35 }
 0x1e9   : > { %v1510_v24 = vsel %vm1236_vm12, %v1494_v47, %v3576_v12  ;;  %v1511_v40 = vsel %vm1236_vm12, %v1495_v63, %v3577_v17  ;;  %3243 = vmatprep.mubr.msk.bf16.mxu0 %vm1577_vm13, %v2105_v32 }
 0x1ea   : > { %v1523_v36 = vpack.c.bf16 %v1511_v40, %v1510_v24  ;;  %v3585_v41 = vpop.permute.xlu0 %3584  ;;  %v2094_v22 = vsel %vm1236_vm12, %v2078_v28, %v3582_v37  ;;  %v2093_v26 = vsel %vm1236_vm12, %v2077_v18, %v3581_v16  ;;  %v1340_v37 = vsel %vm4497_vm2, 0.0, %v4532_v13  ;;  %v3036_v16 = vld [vmem:[%s4065_s21 + $0x8f] sm:$0xff] }
 0x1eb   : > { %v2106_v31 = vpack.c.bf16 %v2094_v22, %v2093_v26  ;;  %v3590_v23 = vpop.permute.xlu1 %3589  ;;  %v3587_v39 = vunpack.i.h.bf16 %v3585_v41  ;;  %v3586_v5 = vunpack.i.l.bf16 %v3585_v41 }
 0x1ec   : > { %3188 = vmatmul.mubr.msk.bf16.gmra.mrb[4].mxu1 %vm1577_vm13, %v1523_v36  ;;  %v3592_v46 = vunpack.i.h.bf16 %v3590_v23  ;;  %v3591_v49 = vunpack.i.l.bf16 %v3590_v23 }
 0x1ed   : > { %3244 = vmatmul.mubr.msk.bf16.gmra.mrb[4].mxu0 %vm1577_vm13, %v2106_v31  ;;  %v1497_v51 = vsel %vm1219_vm11, %v4502_v48, %v3587_v39  ;;  %v1496_v52 = vsel %vm1219_vm11, %v1336_v33, %v3586_v5  ;;  %v1921_v48 = vsel %vm4478_vm1, 0.0, %v4532_v13  ;;  %v3038_v31 = vld [vmem:[%s4065_s21 + $0x9f] sm:$0xff]  ;;  %v3037_v5 = vld [vmem:[%s4065_s21 + $0x97] sm:$0xff]  ;;  %v1923_v33 = vsel %vm4497_vm2, 0.0, %v3036_v16  ;;  %s3687_s21 = sshll.u32 %s3782_s23, 4  ;;  %s3688_s21 = int_to_ptr.vmem [resolvable:$false] %s3687_s21 }
 0x1ee   : > { %v3595_v42 = vpop.permute.xlu0 %3594  ;;  %v2080_v1 = vsel %vm1219_vm11, %v4513_v57, %v3592_v46  ;;  %v2079_v38 = vsel %vm1219_vm11, %v1919_v53, %v3591_v49  ;;  %s3689_s12 = scalar_lea.vmem %s3688_s21, 4096  ;;  %p3690_p4 = scmp.lt.s32.totalorder %s4788_s28, %s3688_s21 }
 0x1ef   : > { %v3600_v29 = vpop.permute.xlu1 %3599  ;;  %v3597_v54 = vunpack.i.h.bf16 %v3595_v42  ;;  %v3596_v55 = vunpack.i.l.bf16 %v3595_v42 }
 0x1f0   : > { %v3602_v45 = vunpack.i.h.bf16 %v3600_v29  ;;  %v3601_v0 = vunpack.i.l.bf16 %v3600_v29 }
 0x1f1   : > { %v1499_v44 = vsel %vm1219_vm11, %v4513_v57, %v3597_v54  ;;  %v1498_v8 = vsel %vm1219_vm11, %v1338_v25, %v3596_v55 }
 0x1f2   : > { %v3605_v50 = vpop.permute.xlu0 %3604  ;;  %v1513_v58 = vsel %vm1236_vm12, %v1497_v51, %v3602_v45  ;;  %v1512_v19 = vsel %vm1236_vm12, %v1496_v52, %v3601_v0  ;;  %v1342_v45 = vsel %vm4534_vm3, 0.0, %v3036_v16 }
 0x1f3   : > { %v1524_v59 = vpack.c.bf16 %v1513_v58, %v1512_v19  ;;  %v3610_v60 = vpop.permute.xlu1 %3609  ;;  %v3607_v2 = vunpack.i.h.bf16 %v3605_v50  ;;  %v3606_v3 = vunpack.i.l.bf16 %v3605_v50 }
 0x1f4   : > { %v3612_v61 = vunpack.i.h.bf16 %v3610_v60  ;;  %v3611_v62 = vunpack.i.l.bf16 %v3610_v60 }
 0x1f5   : > { %3191 = vmatprep.mubr.msk.bf16.mxu1 %vm1577_vm13, %v1524_v59  ;;  %v2082_v57 = vsel %vm1219_vm11, %v4544_v27, %v3607_v2  ;;  %v2081_v47 = vsel %vm1219_vm11, %v1921_v48, %v3606_v3 }
 0x1f6   : > { %v3615_v56 = vpop.permute.xlu0 %3614  ;;  %v2095_v30 = vsel %vm1236_vm12, %v2079_v38, %v3611_v62  ;;  %v2096_v6 = vsel %vm1236_vm12, %v2080_v1, %v3612_v61 }
 0x1f7   : > { %v3617_v10 = vunpack.i.h.bf16 %v3615_v56  ;;  %v3616_v14 = vunpack.i.l.bf16 %v3615_v56  ;;  %v2107_v4 = vpack.c.bf16 %v2096_v6, %v2095_v30  ;;  %v3620_v9 = vpop.permute.xlu1 %3619 }
 0x1f8   : > { %v3622_v17 = vunpack.i.h.bf16 %v3620_v9  ;;  %v3621_v12 = vunpack.i.l.bf16 %v3620_v9 }
 0x1f9   : > { %v1514_v7 = vsel %vm1236_vm12, %v1498_v8, %v3616_v14  ;;  %v1515_v43 = vsel %vm1236_vm12, %v1499_v44, %v3617_v10  ;;  %3247 = vmatprep.mubr.msk.bf16.mxu0 %vm1577_vm13, %v2107_v4  ;;  %v3681_v4 = vld [vmem:[%s4850_s3] sm:$0xff]  }
 0x1fa   : > { %v1525_v11 = vpack.c.bf16 %v1515_v43, %v1514_v7  ;;  %v3625_v63 = vpop.permute.xlu0 %3624  ;;  %v2098_v20 = vsel %vm1236_vm12, %v2082_v57, %v3622_v17  ;;  %v2097_v21 = vsel %vm1236_vm12, %v2081_v47, %v3621_v12  ;;  %3255 = vmatprep.subr.bf16.mxu1 %v3681_v4  ;;  %v3682_v7 = vld [vmem:[%s4850_s3 + $0x8] sm:$0xff]  }
 0x1fb   : > { %v2108_v32 = vpack.c.bf16 %v2098_v20, %v2097_v21  ;;  %v3630_v24 = vpop.permute.xlu1 %3629  ;;  %v3627_v35 = vunpack.i.h.bf16 %v3625_v63  ;;  %v3626_v36 = vunpack.i.l.bf16 %v3625_v63  ;;  %3256 = vmatpush3.bf16.msra.mxu1 %v3681_v4  ;;  %v4708_v63 = vld [vmem:[%s4852_s5] ss:$0 sm:$0xff] }
 0x1fc   : > { %3192 = vmatmul.mubr.msk.bf16.gmra.mrb[8].mxu1 %vm1577_vm13, %v1525_v11  ;;  %v3632_v28 = vunpack.i.h.bf16 %v3630_v24  ;;  %v3631_v18 = vunpack.i.l.bf16 %v3630_v24  ;;  %3257 = vmatprep.subr.bf16.mxu1 %v3682_v7 }
 0x1fd   : > { %3248 = vmatmul.mubr.msk.bf16.gmra.mrb[8].mxu0 %vm1577_vm13, %v2108_v32  ;;  %v1501_v42 = vsel %vm1219_vm11, %v4544_v27, %v3627_v35  ;;  %v1500_v39 = vsel %vm1219_vm11, %v1340_v37, %v3626_v36  ;;  %v1925_v27 = vsel %vm4534_vm3, 0.0, %v3038_v31 }
 0x1fe   : > { %v3635_v40 = vpop.permute.xlu0 %3634  ;;  %v2084_v51 = vsel %vm1219_vm11, %v3037_v5, %v3632_v28  ;;  %v2083_v34 = vsel %vm1219_vm11, %v1923_v33, %v3631_v18 }
 0x1ff   : > { %v3640_v41 = vpop.permute.xlu1 %3639  ;;  %v3637_v29 = vunpack.i.h.bf16 %v3635_v40  ;;  %v3636_v46 = vunpack.i.l.bf16 %v3635_v40  ;;  %3258 = vmatpush3.bf16.msra.mxu1 %v3682_v7 }
 0x200   : > { %v3642_v22 = vunpack.i.h.bf16 %v3640_v41  ;;  %v3641_v26 = vunpack.i.l.bf16 %v3640_v41 }
 0x201   : > { %v1503_v59 = vsel %vm1219_vm11, %v3037_v5, %v3637_v29  ;;  %v1502_v48 = vsel %vm1219_vm11, %v1342_v45, %v3636_v46 }
 0x202   : > { %v3645_v23 = vpop.permute.xlu0 %3644  ;;  %v1517_v13 = vsel %vm1236_vm12, %v1501_v42, %v3642_v22  ;;  %v1516_v49 = vsel %vm1236_vm12, %v1500_v39, %v3641_v26 }
 0x203   : > { %v1526_v0 = vpack.c.bf16 %v1517_v13, %v1516_v49  ;;  %v3650_v50 = vpop.permute.xlu1 %3649  ;;  %v3647_v55 = vunpack.i.h.bf16 %v3645_v23  ;;  %v3646_v58 = vunpack.i.l.bf16 %v3645_v23 }
 0x204   : > { %v3652_v52 = vunpack.i.h.bf16 %v3650_v50  ;;  %v3651_v53 = vunpack.i.l.bf16 %v3650_v50 }
 0x205   : > { %3195 = vmatprep.mubr.msk.bf16.mxu1 %vm1577_vm13, %v1526_v0  ;;  %v2086_v14 = vsel %vm1219_vm11, %v3039_v15, %v3647_v55  ;;  %v2085_v44 = vsel %vm1219_vm11, %v1925_v27, %v3646_v58 }
 0x206   : > { %v3655_v54 = vpop.permute.xlu0 %3654  ;;  %v2099_v60 = vsel %vm1236_vm12, %v2083_v34, %v3651_v53  ;;  %v2100_v1 = vsel %vm1236_vm12, %v2084_v51, %v3652_v52 }
 0x207   : > { %v3657_v19 = vunpack.i.h.bf16 %v3655_v54  ;;  %v3656_v25 = vunpack.i.l.bf16 %v3655_v54  ;;  %v2109_v38 = vpack.c.bf16 %v2100_v1, %v2099_v60  ;;  %v3660_v56 = vpop.permute.xlu1 %3659 }
 0x208   : > { %v3662_v3 = vunpack.i.h.bf16 %v3660_v56  ;;  %v3661_v10 = vunpack.i.l.bf16 %v3660_v56 }
 0x209   : > { %v1518_v61 = vsel %vm1236_vm12, %v1502_v48, %v3656_v25  ;;  %v1519_v62 = vsel %vm1236_vm12, %v1503_v59, %v3657_v19  ;;  %3251 = vmatprep.mubr.msk.bf16.mxu0 %vm1577_vm13, %v2109_v38 }
 0x20a   : > { %v1527_v2 = vpack.c.bf16 %v1519_v62, %v1518_v61  ;;  %v2102_v8 = vsel %vm1236_vm12, %v2086_v14, %v3662_v3  ;;  %v2101_v30 = vsel %vm1236_vm12, %v2085_v44, %v3661_v10 }
 0x20b   : > { %v2110_v6 = vpack.c.bf16 %v2102_v8, %v2101_v30 }
 0x20c   : > { %3196 = vmatmul.mubr.msk.bf16.gmra.mrb[12].mxu1 %vm1577_vm13, %v1527_v2 }
 0x20d   : > { %3252 = vmatmul.mubr.msk.bf16.gmra.mrb[12].mxu0 %vm1577_vm13, %v2110_v6 }
 0x2af   : > { %v3185_v43 = vpop.f32.mrb[0].mxu1 }
 0x2b0   : > { %v1636_v9 = vpop.f32.mrb[1].mxu1  ;;  %v3241_v12 = vpop.f32.mrb[0].mxu0 }
 0x2b1   : > { %v3186_v11 = vpop.f32.mrb[2].mxu1  ;;  %v3291_v57 = vadd.f32 %v3241_v12, %v3185_v43  ;;  %v2218_v47 = vpop.f32.mrb[1].mxu0 }
 0x2b2   : > { %v1639_v17 = vpop.f32.mrb[3].mxu1  ;;  %v3292_v20 = vadd.f32 %v2218_v47, %v1636_v9  ;;  %v3242_v21 = vpop.f32.mrb[2].mxu0 }
 0x2b3   : > { %v2306_v32 = vadd.f32 %v3291_v57, %v4708_v63  ;;  %v3293_v24 = vadd.f32 %v3242_v21, %v3186_v11  ;;  %v2221_v40 = vpop.f32.mrb[3].mxu0 }
 0x2b4   : > { %v2304_v35 = vadd.f32 %v3292_v20, %v4708_v63  ;;  %v3294_v36 = vadd.f32 %v2221_v40, %v1639_v17 }
 0x2b5   : > { %v2307_v37 = vadd.f32 %v3293_v24, %v4708_v63  ;;  %v2322_v41 = vmax.f32 %v2306_v32, 0.0 }
 0x2b6   : > { %v2305_v16 = vadd.f32 %v3294_v36, %v4708_v63  ;;  %v2320_v18 = vmax.f32 %v2304_v35, 0.0 }
 0x2b7   : > { %v2323_v28 = vmax.f32 %v2307_v37, 0.0 }
 0x2b8   : > { %v2321_v22 = vmax.f32 %v2305_v16, 0.0 }
 0x2b9   : > { %v2337_v26 = vpack.c.bf16 %v2323_v28, %v2322_v41 }
 0x2ba   : > { %v2336_v31 = vpack.c.bf16 %v2321_v22, %v2320_v18 }
 0x2bc   : > { %3259 = vmatprep.mubr.msk.bf16.mxu1 %vm1219_vm11, %v2336_v31 }
 0x2bd   : > { %3260 = vmatmul.mubr.msk.bf16.vlgmr.msra.gmra.mrb[16].mxu1 %vm1219_vm11, %v2337_v26 }
 0x2bf   : > { %v3189_v23 = vpop.f32.mrb[4].mxu1 }
 0x2c0   : > { %v1652_v42 = vpop.f32.mrb[5].mxu1  ;;  %v3245_v33 = vpop.f32.mrb[4].mxu0 }
 0x2c1   : > { %v3190_v39 = vpop.f32.mrb[6].mxu1  ;;  %v3295_v29 = vadd.f32 %v3245_v33, %v3189_v23  ;;  %v2234_v46 = vpop.f32.mrb[5].mxu0  ;;  %v2952_v33 = vld [vmem:[%s4736_s22] sm:$0xff]  }
 0x2c2   : > { %v1655_v5 = vpop.f32.mrb[7].mxu1  ;;  %v3296_v13 = vadd.f32 %v2234_v46, %v1652_v42  ;;  %v3246_v49 = vpop.f32.mrb[6].mxu0 }
 0x2c3   : > { %v2310_v45 = vadd.f32 %v3295_v29, %v4708_v63  ;;  %v3297_v0 = vadd.f32 %v3246_v49, %v3190_v39  ;;  %v2237_v27 = vpop.f32.mrb[7].mxu0 }
 0x2c4   : > { %v2308_v50 = vadd.f32 %v3296_v13, %v4708_v63  ;;  %v3298_v51 = vadd.f32 %v2237_v27, %v1655_v5  ;;  %v3040_v5 = vld [vmem:[%s4736_s22 + $0x8] sm:$0xff]   ;;  %v2953_v13 = vunpack.c.l.bf16 %v2952_v33 }
 0x2c5   : > { %v2311_v34 = vadd.f32 %v3297_v0, %v4708_v63  ;;  %v2326_v53 = vmax.f32 %v2310_v45, 0.0  ;;  %v2957_v29 = vunpack.c.l.bf16 %v3040_v5  ;;  %v2958_v0 = vunpack.c.h.bf16 %v3040_v5 }
 0x2c6   : > { %v2309_v52 = vadd.f32 %v3298_v51, %v4708_v63  ;;  %v2324_v55 = vmax.f32 %v2308_v50, 0.0  ;;  %v2954_v51 = vunpack.c.h.bf16 %v2952_v33 }
 0x2c7   : > { %v2327_v54 = vmax.f32 %v2311_v34, 0.0 }
 0x2c8   : > { %v2325_v58 = vmax.f32 %v2309_v52, 0.0 }
 0x2c9   : > { %v2339_v19 = vpack.c.bf16 %v2327_v54, %v2326_v53 }
 0x2ca   : > { %v2338_v25 = vpack.c.bf16 %v2325_v58, %v2324_v55 }
 0x2cc   : > { %3263 = vmatprep.mubr.msk.bf16.mxu1 %vm1219_vm11, %v2338_v25 }
 0x2cd   : > { %3264 = vmatmul.mubr.msk.bf16.gmra.mrb[20].mxu1 %vm1219_vm11, %v2339_v19 }
 0x2cf   : > { %v3193_v59 = vpop.f32.mrb[8].mxu1 }
 0x2d0   : > { %v1668_v48 = vpop.f32.mrb[9].mxu1  ;;  %v3249_v1 = vpop.f32.mrb[8].mxu0 }
 0x2d1   : > { %v3194_v15 = vpop.f32.mrb[10].mxu1  ;;  %v3299_v38 = vadd.f32 %v3249_v1, %v3193_v59  ;;  %v2250_v61 = vpop.f32.mrb[9].mxu0  ;;  %v3041_v1 = vld [vmem:[%s4736_s22 + $0x10] sm:$0xff]  }
 0x2d2   : > { %v1671_v60 = vpop.f32.mrb[11].mxu1  ;;  %v3300_v62 = vadd.f32 %v2250_v61, %v1668_v48  ;;  %v3250_v56 = vpop.f32.mrb[10].mxu0 }
 0x2d3   : > { %v2314_v2 = vadd.f32 %v3299_v38, %v4708_v63  ;;  %v3301_v3 = vadd.f32 %v3250_v56, %v3194_v15  ;;  %v2253_v10 = vpop.f32.mrb[11].mxu0 }
 0x2d4   : > { %v2312_v14 = vadd.f32 %v3300_v62, %v4708_v63  ;;  %v3302_v44 = vadd.f32 %v2253_v10, %v1671_v60  ;;  %v3042_v60 = vld [vmem:[%s4736_s22 + $0x18] sm:$0xff]   ;;  %v2961_v62 = vunpack.c.l.bf16 %v3041_v1 }
 0x2d5   : > { %v2315_v8 = vadd.f32 %v3301_v3, %v4708_v63  ;;  %v2330_v6 = vmax.f32 %v2314_v2, 0.0  ;;  %v2965_v38 = vunpack.c.l.bf16 %v3042_v60  ;;  %v2966_v3 = vunpack.c.h.bf16 %v3042_v60 }
 0x2d6   : > { %v2313_v30 = vadd.f32 %v3302_v44, %v4708_v63  ;;  %v2328_v7 = vmax.f32 %v2312_v14, 0.0  ;;  %v2962_v44 = vunpack.c.h.bf16 %v3041_v1 }
 0x2d7   : > { %v2331_v4 = vmax.f32 %v2315_v8, 0.0 }
 0x2d8   : > { %v2329_v43 = vmax.f32 %v2313_v30, 0.0 }
 0x2d9   : > { %v2341_v9 = vpack.c.bf16 %v2331_v4, %v2330_v6 }
 0x2da   : > { %v2340_v11 = vpack.c.bf16 %v2329_v43, %v2328_v7 }
 0x2dc   : > { %3267 = vmatprep.mubr.msk.bf16.mxu1 %vm1219_vm11, %v2340_v11 }
 0x2dd   : > { %3268 = vmatmul.mubr.msk.bf16.gmra.mrb[24].mxu1 %vm1219_vm11, %v2341_v9 }
 0x2df   : > { %v3197_v17 = vpop.f32.mrb[12].mxu1 }
 0x2e0   : > { %v1684_v12 = vpop.f32.mrb[13].mxu1  ;;  %v3253_v20 = vpop.f32.mrb[12].mxu0 }
 0x2e1   : > { %v3198_v57 = vpop.f32.mrb[14].mxu1  ;;  %v3303_v21 = vadd.f32 %v3253_v20, %v3197_v17  ;;  %v2266_v32 = vpop.f32.mrb[13].mxu0  ;;  %v3043_v20 = vld [vmem:[%s4736_s22 + $0x20] sm:$0xff]  }
 0x2e2   : > { %v1687_v47 = vpop.f32.mrb[15].mxu1  ;;  %v3304_v24 = vadd.f32 %v2266_v32, %v1684_v12  ;;  %v3254_v40 = vpop.f32.mrb[14].mxu0 }
 0x2e3   : > { %v2318_v35 = vadd.f32 %v3303_v21, %v4708_v63  ;;  %v3305_v36 = vadd.f32 %v3254_v40, %v3198_v57  ;;  %v2269_v37 = vpop.f32.mrb[15].mxu0 }
 0x2e4   : > { %v2316_v16 = vadd.f32 %v3304_v24, %v4708_v63  ;;  %v3306_v41 = vadd.f32 %v2269_v37, %v1687_v47  ;;  %v3044_v47 = vld [vmem:[%s4736_s22 + $0x28] sm:$0xff]   ;;  %v2969_v24 = vunpack.c.l.bf16 %v3043_v20 }
 0x2e5   : > { %v2319_v28 = vadd.f32 %v3305_v36, %v4708_v63  ;;  %v2334_v22 = vmax.f32 %v2318_v35, 0.0  ;;  %v2973_v21 = vunpack.c.l.bf16 %v3044_v47  ;;  %v2974_v36 = vunpack.c.h.bf16 %v3044_v47 }
 0x2e6   : > { %v2317_v18 = vadd.f32 %v3306_v41, %v4708_v63  ;;  %v2332_v31 = vmax.f32 %v2316_v16, 0.0  ;;  %v4743_v63 = vld [vmem:[%s4853_s6] ss:$0 sm:$0xff]  ;;  %v2970_v41 = vunpack.c.h.bf16 %v3043_v20 }
 0x2e7   : > { %v2335_v26 = vmax.f32 %v2319_v28, 0.0 }
 0x2e8   : > { %v2333_v23 = vmax.f32 %v2317_v18, 0.0 }
 0x2e9   : > { %v2343_v42 = vpack.c.bf16 %v2335_v26, %v2334_v22 }
 0x2ea   : > { %v2342_v39 = vpack.c.bf16 %v2333_v23, %v2332_v31 }
 0x2ec   : > { %3271 = vmatprep.mubr.msk.bf16.mxu1 %vm1219_vm11, %v2342_v39 }
 0x2ed   : > { %3272 = vmatmul.mubr.msk.bf16.gmra.mrb[28].mxu1 %vm1219_vm11, %v2343_v42 }
 0x390   : > { %v3261_v46 = vpop.f32.mrb[16].mxu1 }
 0x391   : > { %v2469_v49 = vadd.f32 %v3261_v46, %v4743_v63  ;;  %v2460_v45 = vpop.f32.mrb[17].mxu1  ;;  %v3046_v46 = vld [vmem:[%s4736_s22 + $0x38] sm:$0xff]  }
 0x392   : > { %v2461_v27 = vadd.f32 %v4743_v63, %v2460_v45  ;;  %v3262_v50 = vpop.f32.mrb[18].mxu1 }
 0x393   : > { %v2525_v34 = vadd.f32 %v2957_v29, %v2469_v49  ;;  %v2472_v52 = vadd.f32 %v3262_v50, %v4743_v63  ;;  %v2463_v53 = vpop.f32.mrb[19].mxu1  ;;  %v2981_v49 = vunpack.c.l.bf16 %v3046_v46 }
 0x394   : > { %v2523_v54 = vadd.f32 %v2953_v13, %v2461_v27  ;;  %v2464_v55 = vadd.f32 %v4743_v63, %v2463_v53  ;;  %v3045_v13 = vld [vmem:[%s4736_s22 + $0x30] sm:$0xff]   ;;  %s3683_s22 = scalar_lea.vmem %s4788_s28, 2048 }
 0x395   : > { %v2541_v58 = vmax.f32 %v2525_v34, 0.0  ;;  %v2526_v19 = vadd.f32 %v2958_v0, %v2472_v52  ;;  %v2977_v0 = vunpack.c.l.bf16 %v3045_v13  ;;  %v2978_v53 = vunpack.c.h.bf16 %v3045_v13  ;;  %p3684_p0 = scmp.ne.s32.totalorder %s4788_s28, %s3683_s22  ;;  %p3691_p5 = scmp.lt.s32.totalorder %s3689_s12, %s3683_s22 }
 0x396   : > { %v2539_v25 = vmax.f32 %v2523_v54, 0.0  ;;  %v2524_v59 = vadd.f32 %v2954_v51, %v2464_v55  ;;  %v2982_v51 = vunpack.c.h.bf16 %v3046_v46 }
 0x397   : > { %2557 = vst [vmem:[%s3906_s13 + $0x10] sm:$0xff] %v2541_v58  ;;  %v2542_v48 = vmax.f32 %v2526_v19, 0.0  ;;  %p3685_p1 = pnand %p3684_p0, %p3876_p3  ;;  %p3692_p6 = por %p3691_p5, %p3690_p4 }
 0x398   : > { %2555 = vst [vmem:[%s3906_s13] sm:$0xff] %v2539_v25  ;;  %v2540_v15 = vmax.f32 %v2524_v59, 0.0 }
 0x399   : > { %2558 = vst [vmem:[%s3906_s13 + $0x18] sm:$0xff] %v2542_v48  ;;  %p3686_p2 = pneg %p3685_p1 }
 0x39a   : > { %2556 = vst [vmem:[%s3906_s13 + $0x8] sm:$0xff] %v2540_v15 }
 0x39b   : > { %p3693_p7 = pnand %p3692_p6, %p3686_p2 }
 0x3a0   : > { %v3265_v61 = vpop.f32.mrb[20].mxu1 }
 0x3a1   : > { %v2485_v56 = vadd.f32 %v3265_v61, %v4743_v63  ;;  %v2476_v2 = vpop.f32.mrb[21].mxu1 }
 0x3a2   : > { %v2477_v10 = vadd.f32 %v4743_v63, %v2476_v2  ;;  %v3266_v14 = vpop.f32.mrb[22].mxu1 }
 0x3a3   : > { %v2529_v8 = vadd.f32 %v2965_v38, %v2485_v56  ;;  %v2488_v30 = vadd.f32 %v3266_v14, %v4743_v63  ;;  %v2479_v6 = vpop.f32.mrb[23].mxu1 }
 0x3a4   : > { %v2527_v4 = vadd.f32 %v2961_v62, %v2477_v10  ;;  %v2480_v7 = vadd.f32 %v4743_v63, %v2479_v6 }
 0x3a5   : > { %v2545_v43 = vmax.f32 %v2529_v8, 0.0  ;;  %v2530_v9 = vadd.f32 %v2966_v3, %v2488_v30 }
 0x3a6   : > { %v2543_v11 = vmax.f32 %v2527_v4, 0.0  ;;  %v2528_v17 = vadd.f32 %v2962_v44, %v2480_v7 }
 0x3a7   : > { %2561 = vst [vmem:[%s3906_s13 + $0x30] sm:$0xff] %v2545_v43  ;;  %v2546_v12 = vmax.f32 %v2530_v9, 0.0 }
 0x3a8   : > { %2559 = vst [vmem:[%s3906_s13 + $0x20] sm:$0xff] %v2543_v11  ;;  %v2544_v57 = vmax.f32 %v2528_v17, 0.0 }
 0x3a9   : > { %2562 = vst [vmem:[%s3906_s13 + $0x38] sm:$0xff] %v2546_v12 }
 0x3aa   : > { %2560 = vst [vmem:[%s3906_s13 + $0x28] sm:$0xff] %v2544_v57 }
 0x3b0   : > { %v3269_v32 = vpop.f32.mrb[24].mxu1 }
 0x3b1   : > { %v2501_v40 = vadd.f32 %v3269_v32, %v4743_v63  ;;  %v2492_v35 = vpop.f32.mrb[25].mxu1 }
 0x3b2   : > { %v2493_v37 = vadd.f32 %v4743_v63, %v2492_v35  ;;  %v3270_v16 = vpop.f32.mrb[26].mxu1 }
 0x3b3   : > { %v2533_v28 = vadd.f32 %v2973_v21, %v2501_v40  ;;  %v2504_v18 = vadd.f32 %v3270_v16, %v4743_v63  ;;  %v2495_v22 = vpop.f32.mrb[27].mxu1 }
 0x3b4   : > { %v2531_v26 = vadd.f32 %v2969_v24, %v2493_v37  ;;  %v2496_v31 = vadd.f32 %v4743_v63, %v2495_v22 }
 0x3b5   : > { %v2549_v23 = vmax.f32 %v2533_v28, 0.0  ;;  %v2534_v42 = vadd.f32 %v2974_v36, %v2504_v18 }
 0x3b6   : > { %v2547_v39 = vmax.f32 %v2531_v26, 0.0  ;;  %v2532_v5 = vadd.f32 %v2970_v41, %v2496_v31 }
 0x3b7   : > { %2565 = vst [vmem:[%s3906_s13 + $0x50] sm:$0xff] %v2549_v23  ;;  %v2550_v33 = vmax.f32 %v2534_v42, 0.0 }
 0x3b8   : > { %2563 = vst [vmem:[%s3906_s13 + $0x40] sm:$0xff] %v2547_v39  ;;  %v2548_v29 = vmax.f32 %v2532_v5, 0.0 }
 0x3b9   : > { %2566 = vst [vmem:[%s3906_s13 + $0x58] sm:$0xff] %v2550_v33 }
 0x3ba   : > { %2564 = vst [vmem:[%s3906_s13 + $0x48] sm:$0xff] %v2548_v29 }
 0x3c0   : > { %v3273_v45 = vpop.f32.mrb[28].mxu1 }
 0x3c1   : > { %v2517_v27 = vadd.f32 %v3273_v45, %v4743_v63  ;;  %v2508_v50 = vpop.f32.mrb[29].mxu1 }
 0x3c2   : > { %v2509_v34 = vadd.f32 %v4743_v63, %v2508_v50  ;;  %v3274_v52 = vpop.f32.mrb[30].mxu1 }
 0x3c3   : > { %v2537_v54 = vadd.f32 %v2981_v49, %v2517_v27  ;;  %v2520_v55 = vadd.f32 %v3274_v52, %v4743_v63  ;;  %v2511_v58 = vpop.f32.mrb[31].mxu1 }
 0x3c4   : > { %v2535_v19 = vadd.f32 %v2977_v0, %v2509_v34  ;;  %v2512_v25 = vadd.f32 %v4743_v63, %v2511_v58 }
 0x3c5   : > { %v2553_v59 = vmax.f32 %v2537_v54, 0.0  ;;  %v2538_v48 = vadd.f32 %v2982_v51, %v2520_v55 }
 0x3c6   : > { %v2551_v15 = vmax.f32 %v2535_v19, 0.0  ;;  %v2536_v60 = vadd.f32 %v2978_v53, %v2512_v25 }
 0x3c7   : > { %2569 = vst [vmem:[%s3906_s13 + $0x70] sm:$0xff] %v2553_v59  ;;  %v2554_v1 = vmax.f32 %v2538_v48, 0.0 }
 0x3c8   : > { %2567 = vst [vmem:[%s3906_s13 + $0x60] sm:$0xff] %v2551_v15  ;;  %v2552_v63 = vmax.f32 %v2536_v60, 0.0 }
 0x3c9   : > { %2570 = vst [vmem:[%s3906_s13 + $0x78] sm:$0xff] %v2554_v1 }
 0x3ca   : > { %2568 = vst [vmem:[%s3906_s13 + $0x68] sm:$0xff] %v2552_v63 }
 0x3cb   : > { %3696 = shalt.err (!%p3693_p7)
}
 0x3cc   : > { %s3697_s20 = scalar_lea.hbm %s4786_s16, 2048  ;;  %s3701_s11 = scalar_lea.hbm %s4854_s7, 8192 }
 0x3cd   : > { %p3698_p9 = scmp.ne.s32.totalorder %s4786_s16, %s3697_s20  ;;  %p3702_p12 = scmp.lt.u32.totalorder %s4786_s16, %s4854_s7 }
 0x3ce   : > { %p3703_p13 = scmp.lt.u32.totalorder %s3701_s11, %s3697_s20  ;;  %p3705_p1 = scmp.lt.u32.totalorder %s3697_s20, %s4786_s16 }
 0x3cf   : > { %p3699_p10 = pnand %p3698_p9, %p3876_p3 }
 0x3d0   : > { %p3704_p0 = por %p3703_p13, %p3702_p12 }
 0x3d1   : > { %p3700_p11 = pneg %p3699_p10 }
 0x3d2   : > { %p3706_p2 = por %p3705_p1, %p3704_p0 }
 0x3d4   : > { %p3707_p4 = pnand %p3706_p2, %p3700_p11 }
 0x3d6   : > { %3710 = shalt.err (!%p3707_p4)
}
 0x3d7   : > { %s3783_s10 = smov 128   ;;  %s3784_s22 = smov 8  }
 0x3d8   : > { %3323 = dma.vmem_to_hbm [thread:$0]  (%p3876_p3), %s4788_s28, 2048, %s4786_s16, %s4795_s17, %s3783_s10, %s3783_s10, %s3784_s22  }
 0x3d9 PF: > { %p3329_p5 = scmp.ge.s32.totalorder %s3777_s8, 2  ;;  %s2603_s23 = sand.u32 1, %s3749_s24  }
 0x3da   : > { %s2604_s21 = scalar_lea.sflag [#allocation4], %s2603_s23 }
 0x3db   : > { %p3326_p6 = pnand %p3329_p5, %p3885_p8 }
 0x3dd   : > { %3744 = dma.done.wait (!%p3326_p6), %s2604_s21, 2048  }
 0x3de   : > { %3746 = vsyncadd (!%p3326_p6), %s2604_s21, 4294965248  ;;  %s20_s8 = sadd.s32 1, %s3777_s8   ;;  %s4893_s14 = sld [smem:[#allocation6_spill]] }
 0x3df   : > { %p17_p7 = scmp.ge.s32.totalorder %s20_s8, 6   ;;  %s4894_s16 = sld [smem:[#allocation7_spill]] }
 0x3e0   : > { %s4895_s24 = smov %s3753_s25  ;;  %s4896_s25 = smov %s3757_s26 }
 0x3e1   : > { %s4897_s26 = smov %s3894_s19  ;;  %s4898_s27 = smov %s3769_s29 }
 0x3e2   : > { %s4899_s28 = smov %s3773_s30  ;;  %19 = sbr.rel (!%p17_p7) target bundleno = 5 (0x5), region = 99 }
 0x3e4   : > { %s4900_s29 = smov %s4893_s14 }
 0x3e5   : > { %s4901_s30 = smov %s4894_s16 }
 0x3e9   :  { %2609 = vsyncpa [#allocation4], 1 }
 0x3ea   :  { %2611 = vsyncpa [#allocation4 + $0x1], 1 }

</bundles_post_ra>
